<compile_context>
chip_gen: v7x
topology: tpu7x:2x2x1
jax: 0.10.0
libtpu: 0.0.40
codegen_flags: <defaults>
</compile_context>

<pallas_src>
import functools
import numpy as np
import jax
import jax.numpy as jnp
from jax import lax
from jax.experimental import pallas as pl
from jax.experimental.pallas import tpu as pltpu

EPS = 1e-12  # variance_epsilon (TF-style LayerNorm)

_CAPS = {}   # memoized hardware / capability probes (evaluated eagerly, not under jit)


# ------------------------------ capability probes -----------------------------

def _probe_buffered_one():
    """Check that pl.Buffered(1) on a constant-index input block compiles, runs
    and is numerically correct on this jax/Mosaic version."""
    try:
        def kcopy(x_ref, o_ref):
            o_ref[...] = x_ref[...] + 1.0

        x = jnp.arange(8 * 128, dtype=jnp.float32).reshape(8, 128)
        out = pl.pallas_call(
            kcopy,
            out_shape=jax.ShapeDtypeStruct((16, 128), jnp.float32),
            grid=(2,),
            in_specs=[pl.BlockSpec((8, 128), lambda i: (0, 0),
                                   pipeline_mode=pl.Buffered(1))],
            out_specs=pl.BlockSpec((8, 128), lambda i: (i, 0)),
        )(x)
        out = np.asarray(jax.block_until_ready(out))
        expect = np.concatenate([np.asarray(x) + 1.0] * 2, axis=0)
        return bool(np.allclose(out, expect))
    except Exception:
        return False


def _weight_pipeline_mode():
    """Single-buffer constant-index weight blocks (their block index never changes
    across the grid, so double buffering only doubles VMEM residency)."""
    if 'pm' not in _CAPS:
        _CAPS['pm'] = pl.Buffered(1) if _probe_buffered_one() else None
    return _CAPS['pm']


def _vmem_limit_bytes():
    """Generation-aware VMEM cap: ~3/4 of physical (≈48 MB on 64 MiB v7x,
    ≈96 MB on 128 MiB v5e/v6e), leaving headroom for compiler scratch."""
    if 'vmem' not in _CAPS:
        try:
            cap = int(pltpu.get_tpu_info().vmem_capacity_bytes)
        except Exception:
            cap = 64 * 1024 * 1024
        _CAPS['vmem'] = min((cap * 3) // 4, 100 * 1024 * 1024)
    return _CAPS['vmem']


def _pick_tile(n, cap, step):
    """Largest tile <= cap that is a multiple of `step` and divides n; else n
    (full extent, always a legal block size)."""
    if n <= cap:
        return n
    t = (cap // step) * step
    while t >= step:
        if n % t == 0:
            return t
        t -= step
    return n


def _const_spec(shape):
    """Full-array block whose index never changes across the grid (weights)."""
    nd = len(shape)
    pm = _weight_pipeline_mode()
    if pm is None:
        return pl.BlockSpec(shape, lambda *_: (0,) * nd)
    return pl.BlockSpec(shape, lambda *_: (0,) * nd, pipeline_mode=pm)


# ----------------------------- in-kernel helpers -------------------------------

def _erf_poly(x):
    # Abramowitz & Stegun 7.1.26, |err| < 1.5e-7: exact-erf GELU at fp32 accuracy,
    # built from ops that always lower in Mosaic (exp / mul / add / where).
    a1, a2, a3, a4, a5 = (0.254829592, -0.284496736, 1.421413741,
                          -1.453152027, 1.061405429)
    p = 0.3275911
    ax = jnp.abs(x)
    t = 1.0 / (1.0 + p * ax)
    poly = ((((a5 * t + a4) * t + a3) * t + a2) * t + a1) * t
    y = 1.0 - poly * jnp.exp(-ax * ax)
    return jnp.where(x >= 0.0, y, -y)


def _gelu_exact(x):
    # torch nn.GELU() default (erf-based, not tanh approximation)
    return 0.5 * x * (1.0 + _erf_poly(x * (1.0 / np.sqrt(2.0))))


def _layer_norm(x, gamma, beta):
    u = jnp.mean(x, axis=-1, keepdims=True)
    s = jnp.mean((x - u) ** 2, axis=-1, keepdims=True)
    # rsqrt goes to the EUP (its own VLIW slot) instead of VALU divide+sqrt.
    return gamma * ((x - u) * lax.rsqrt(s + EPS)) + beta


# ---------------------------------- kernels ------------------------------------

def _embed_ln_kernel(e_ref, g_ref, b_ref, o_ref):
    # e: (1, ts, D); gamma/beta: (1, D)
    o_ref[...] = _layer_norm(e_ref[...], g_ref[...], b_ref[...])


def _qkv_kernel(x_ref, wqkv_ref, bqkv_ref, q_ref, k_ref, v_ref, *, n_heads):
    """Fused Q/K/V projection for a (tm, D) row tile; emits head-major bf16.
    The 1/sqrt(wd) scale is pre-folded into the Q weight/bias at prep time."""
    x = x_ref[0].astype(jnp.bfloat16)                               # (tm, D)
    D = x.shape[-1]
    H = n_heads
    wd = D // H
    qkv = jnp.dot(x, wqkv_ref[...],
                  preferred_element_type=jnp.float32) + bqkv_ref[...]   # (tm, 3D)
    for c, o_ref in enumerate((q_ref, k_ref, v_ref)):
        base = c * D
        heads = jnp.stack(
            [qkv[:, base + h * wd: base + (h + 1) * wd] for h in range(H)],
            axis=0)                                                  # (H, tm, wd)
        o_ref[0] = heads.astype(o_ref.dtype)


def _flash_kernel(q_ref, k_ref, v_ref, maskb_ref, o_ref, m_sc, l_sc, acc_sc):
    """Head-batched online-softmax attention; kv tiles streamed along grid axis 2."""
    ki = pl.program_id(2)

    @pl.when(ki == 0)
    def _():
        m_sc[...] = jnp.full(m_sc.shape, -jnp.inf, dtype=m_sc.dtype)
        l_sc[...] = jnp.zeros(l_sc.shape, dtype=l_sc.dtype)
        acc_sc[...] = jnp.zeros(acc_sc.shape, dtype=acc_sc.dtype)

    q = q_ref[0]                                                     # (H, tq, wd)
    k = k_ref[0]                                                     # (H, tk, wd)
    v = v_ref[0]
    s = jnp.einsum('hqd,hkd->hqk', q, k,
                   preferred_element_type=jnp.float32)               # (H, tq, tk)
    s = s + maskb_ref[0]                      # additive -1e4*(1-mask) bias (1, tk)

    m_prev = m_sc[...]
    m_new = jnp.maximum(m_prev, jnp.max(s, axis=-1, keepdims=True))
    alpha = jnp.exp(m_prev - m_new)
    p = jnp.exp(s - m_new)
    l_sc[...] = alpha * l_sc[...] + jnp.sum(p, axis=-1, keepdims=True)
    acc_sc[...] = alpha * acc_sc[...] + jnp.einsum(
        'hqk,hkd->hqd', p.astype(v.dtype), v, preferred_element_type=jnp.float32)
    m_sc[...] = m_new

    @pl.when(ki == pl.num_programs(2) - 1)
    def _():
        H = acc_sc.shape[0]
        ctx = acc_sc[...] * pl.reciprocal(l_sc[...], approx=True)    # (H, tq, wd)
        # merge heads back to a lane-dense (tq, D) output block
        o_ref[0] = jnp.concatenate([ctx[h] for h in range(H)],
                                   axis=-1).astype(o_ref.dtype)


def _post_kernel(x_ref, ctx_ref, wo_ref, bo_ref, g1_ref, be1_ref,
                 w1_ref, b1_ref, w2_ref, b2_ref, g2_ref, be2_ref, o_ref):
    """Output projection + residual + LN1 + position-wise FFN + residual + LN2
    for a (tm, D) row tile."""
    x = x_ref[0]                                                     # (tm, D) f32
    ctx = ctx_ref[0]                                                 # (tm, D) bf16
    h = jnp.dot(ctx, wo_ref[...], preferred_element_type=jnp.float32) + bo_ref[...]
    x1 = _layer_norm(x + h, g1_ref[...], be1_ref[...])
    ff = jnp.dot(x1.astype(jnp.bfloat16), w1_ref[...],
                 preferred_element_type=jnp.float32) + b1_ref[...]
    ff = _gelu_exact(ff)
    ff = jnp.dot(ff.astype(jnp.bfloat16), w2_ref[...],
                 preferred_element_type=jnp.float32) + b2_ref[...]
    o_ref[0] = _layer_norm(x1 + ff, g2_ref[...], be2_ref[...])


# ---------------------------------- wrappers ------------------------------------

def _embed_layernorm(e, gamma, beta):
    B, S, D = e.shape
    ts = _pick_tile(S, 512, 8)
    return pl.pallas_call(
        _embed_ln_kernel,
        out_shape=jax.ShapeDtypeStruct((B, S, D), jnp.float32),
        grid=(B, S // ts),
        in_specs=[
            pl.BlockSpec((1, ts, D), lambda b, si: (b, si, 0)),
            pl.BlockSpec((1, D), lambda b, si: (0, 0)),
            pl.BlockSpec((1, D), lambda b, si: (0, 0)),
        ],
        out_specs=pl.BlockSpec((1, ts, D), lambda b, si: (b, si, 0)),
        compiler_params=pltpu.CompilerParams(
            dimension_semantics=("parallel", "parallel")),
    )(e, gamma, beta)


def _qkv_proj(x, wqkv, bqkv, n_heads):
    B, S, D = x.shape
    H = n_heads
    wd = D // H
    tm = _pick_tile(S, 256, 8)
    out_sd = jax.ShapeDtypeStruct((B, H, S, wd), jnp.bfloat16)
    head_spec = pl.BlockSpec((1, H, tm, wd), lambda b, si: (b, 0, si, 0))
    return pl.pallas_call(
        functools.partial(_qkv_kernel, n_heads=H),
        out_shape=(out_sd, out_sd, out_sd),
        grid=(B, S // tm),
        in_specs=[
            pl.BlockSpec((1, tm, D), lambda b, si: (b, si, 0)),
            _const_spec((D, 3 * D)),
            _const_spec((1, 3 * D)),
        ],
        out_specs=(head_spec, head_spec, head_spec),
        compiler_params=pltpu.CompilerParams(
            dimension_semantics=("parallel", "parallel"),
            vmem_limit_bytes=_vmem_limit_bytes()),
    )(x, wqkv, bqkv)


def _flash_attention(q, k, v, maskb):
    B, H, S, wd = q.shape
    D = H * wd
    tq = _pick_tile(S, 256, 8)
    tk = _pick_tile(S, 256, 128)   # mask block's last dim must be 128-aligned or full
    return pl.pallas_call(
        _flash_kernel,
        out_shape=jax.ShapeDtypeStruct((B, S, D), jnp.bfloat16),
        grid=(B, S // tq, S // tk),
        in_specs=[
            pl.BlockSpec((1, H, tq, wd), lambda b, qi, ki: (b, 0, qi, 0)),
            pl.BlockSpec((1, H, tk, wd), lambda b, qi, ki: (b, 0, ki, 0)),
            pl.BlockSpec((1, H, tk, wd), lambda b, qi, ki: (b, 0, ki, 0)),
            pl.BlockSpec((1, 1, tk), lambda b, qi, ki: (b, 0, ki)),
        ],
        out_specs=pl.BlockSpec((1, tq, D), lambda b, qi, ki: (b, qi, 0)),
        scratch_shapes=[
            pltpu.VMEM((H, tq, 1), jnp.float32),
            pltpu.VMEM((H, tq, 1), jnp.float32),
            pltpu.VMEM((H, tq, wd), jnp.float32),
        ],
        compiler_params=pltpu.CompilerParams(
            dimension_semantics=("parallel", "parallel", "arbitrary"),
            vmem_limit_bytes=_vmem_limit_bytes()),
    )(q, k, v, maskb)


def _attn_out_ffn(x, ctx, p):
    B, S, D = x.shape
    F = p['w1'].shape[1]
    tm = _pick_tile(S, 256, 8)
    row = pl.BlockSpec((1, tm, D), lambda b, si: (b, si, 0))
    return pl.pallas_call(
        _post_kernel,
        out_shape=jax.ShapeDtypeStruct((B, S, D), jnp.float32),
        grid=(B, S // tm),
        in_specs=[
            row,                                   # x (residual input)
            pl.BlockSpec((1, tm, D), lambda b, si: (b, si, 0)),   # attention ctx
            _const_spec((D, D)), _const_spec((1, D)),             # wo, bo
            _const_spec((1, D)), _const_spec((1, D)),             # gamma1, beta1
            _const_spec((D, F)), _const_spec((1, F)),             # w1, b1
            _const_spec((F, D)), _const_spec((1, D)),             # w2, b2
            _const_spec((1, D)), _const_spec((1, D)),             # gamma2, beta2
        ],
        out_specs=row,
        compiler_params=pltpu.CompilerParams(
            dimension_semantics=("parallel", "parallel"),
            vmem_limit_bytes=_vmem_limit_bytes()),
    )(x, ctx, p['wo'], p['bo'], p['g1'], p['be1'],
      p['w1'], p['b1'], p['w2'], p['b2'], p['g2'], p['be2'])


# --------------------------- one-time parameter prep ----------------------------

def prepare_params(params, n_heads):
    """Hoisted out of the jitted forward: fuse Q/K/V, fold 1/sqrt(wd) into the Q
    projection, cast matmul weights to bf16 once (halves weight HBM traffic and
    VMEM residency). Biases / LayerNorm params stay f32."""
    D = params['tok'].shape[1]
    wd = D // n_heads
    scale = 1.0 / np.sqrt(wd)
    prepped = {
        'tok': params['tok'], 'pos': params['pos'], 'seg': params['seg'],
        'g_e': params['g_e'], 'be_e': params['be_e'], 'blocks': [],
    }
    for p in params['blocks']:
        prepped['blocks'].append(dict(
            wqkv=jnp.concatenate([p['wq'] * scale, p['wk'], p['wv']],
                                 axis=1).astype(jnp.bfloat16),
            bqkv=jnp.concatenate([p['bq'] * scale, p['bk'], p['bv']], axis=1),
            wo=p['wo'].astype(jnp.bfloat16), bo=p['bo'],
            g1=p['g1'], be1=p['be1'],
            w1=p['w1'].astype(jnp.bfloat16), b1=p['b1'],
            w2=p['w2'].astype(jnp.bfloat16), b2=p['b2'],
            g2=p['g2'], be2=p['be2'],
        ))
    return prepped


# ---------------------------------- forward -------------------------------------

@functools.partial(jax.jit, static_argnames=('n_heads',))
def _forward_impl(prepped, ids, seg, mask, *, n_heads):
    B, S = ids.shape
    # Embedding gathers in plain JAX (glue); LayerNorm in a tiled Pallas kernel.
    e = (prepped['tok'][ids]
         + prepped['pos'][jnp.arange(S)][None, :, :]
         + prepped['seg'][seg]).astype(jnp.float32)
    h = _embed_layernorm(e, prepped['g_e'], prepped['be_e'])

    # additive attention bias: scores -= 10000 * (1 - mask)
    maskb = (-10000.0 * (1.0 - mask.astype(jnp.float32)))[:, None, :]   # (B, 1, S)

    # TODO(synk): P10 cross-pallas_call weight prefetch for the next layer.
    for blk in prepped['blocks']:
        q, k, v = _qkv_proj(h, blk['wqkv'], blk['bqkv'], n_heads)
        ctx = _flash_attention(q, k, v, maskb)
        h = _attn_out_ffn(h, ctx, blk)
    return h


def transformer_forward(prepped_params, ids, seg, mask, *, n_heads):
    # Evaluate capability probes eagerly (never under a jit trace).
    _weight_pipeline_mode()
    _vmem_limit_bytes()
    return _forward_impl(prepped_params, ids, seg, mask, n_heads=n_heads)


# ----------------------------- deterministic params ------------------------------

def init_params(key, vocab_size, max_len, n_segments, dim, dim_ff, n_layers):
    std = 0.02
    keys = jax.random.split(key, 3 + n_layers)
    params = {
        'tok': jax.random.normal(keys[0], (vocab_size, dim), jnp.float32) * std,
        'pos': jax.random.normal(keys[1], (max_len, dim), jnp.float32) * std,
        'seg': jax.random.normal(keys[2], (n_segments, dim), jnp.float32) * std,
        'g_e': jnp.ones((1, dim), jnp.float32),
        'be_e': jnp.zeros((1, dim), jnp.float32),
        'blocks': [],
    }
    for l in range(n_layers):
        lk = jax.random.split(keys[3 + l], 6)
        params['blocks'].append({
            'wq': jax.random.normal(lk[0], (dim, dim), jnp.float32) * std,
            'bq': jnp.zeros((1, dim), jnp.float32),
            'wk': jax.random.normal(lk[1], (dim, dim), jnp.float32) * std,
            'bk': jnp.zeros((1, dim), jnp.float32),
            'wv': jax.random.normal(lk[2], (dim, dim), jnp.float32) * std,
            'bv': jnp.zeros((1, dim), jnp.float32),
            'wo': jax.random.normal(lk[3], (dim, dim), jnp.float32) * std,
            'bo': jnp.zeros((1, dim), jnp.float32),
            'g1': jnp.ones((1, dim), jnp.float32),
            'be1': jnp.zeros((1, dim), jnp.float32),
            'w1': jax.random.normal(lk[4], (dim, dim_ff), jnp.float32) * std,
            'b1': jnp.zeros((1, dim_ff), jnp.float32),
            'w2': jax.random.normal(lk[5], (dim_ff, dim), jnp.float32) * std,
            'b2': jnp.zeros((1, dim), jnp.float32),
            'g2': jnp.ones((1, dim), jnp.float32),
            'be2': jnp.zeros((1, dim), jnp.float32),
        })
    return params


# ------------------------------ pure-JAX reference --------------------------------

def ref_forward(params, ids, seg, mask, n_heads):
    def ln(x, g, b):
        u = x.mean(-1, keepdims=True)
        s = ((x - u) ** 2).mean(-1, keepdims=True)
        return g * (x - u) / jnp.sqrt(s + EPS) + b

    B, S = ids.shape
    e = (params['tok'][ids] + params['pos'][jnp.arange(S)][None]
         + params['seg'][seg])
    h = ln(e, params['g_e'], params['be_e'])
    mb = -10000.0 * (1.0 - mask.astype(jnp.float32))[:, None, None, :]
    for p in params['blocks']:
        D = h.shape[-1]
        wd = D // n_heads
        q = h @ p['wq'] + p['bq']
        k = h @ p['wk'] + p['bk']
        v = h @ p['wv'] + p['bv']
        split = lambda t: t.reshape(B, S, n_heads, wd).transpose(0, 2, 1, 3)
        qh, kh, vh = split(q), split(k), split(v)
        s = qh @ kh.transpose(0, 1, 3, 2) / np.sqrt(wd) + mb
        a = jax.nn.softmax(s, axis=-1)
        ctx = (a @ vh).transpose(0, 2, 1, 3).reshape(B, S, D)
        x1 = ln(h + ctx @ p['wo'] + p['bo'], p['g1'], p['be1'])
        ff = jax.nn.gelu(x1 @ p['w1'] + p['b1'], approximate=False) @ p['w2'] + p['b2']
        h = ln(x1 + ff, p['g2'], p['be2'])
    return h


# ------------------------------------- main ---------------------------------------

if __name__ == "__main__":
    # small, forward-consistent shapes
    VOCAB, MAX_LEN, N_SEG = 32, 16, 2
    DIM, DIM_FF, N_HEADS, N_LAYERS = 32, 64, 4, 2
    B, S = 2, 8

    root = jax.random.PRNGKey(0)
    kp, kid, kseg = jax.random.split(root, 3)
    params = init_params(kp, VOCAB, MAX_LEN, N_SEG, DIM, DIM_FF, N_LAYERS)
    prepped = prepare_params(params, N_HEADS)   # one-time, outside the forward jit

    ids = jax.random.randint(kid, (B, S), 0, VOCAB, dtype=jnp.int32)
    seg = jax.random.randint(kseg, (B, S), 0, N_SEG, dtype=jnp.int32)
    # attention mask (1 = valid token); second sequence has 2 padded positions
    mask = (jnp.arange(S)[None, :] < jnp.array([[S], [S - 2]])).astype(jnp.int32)

    out = transformer_forward(prepped, ids, seg, mask, n_heads=N_HEADS)
    out = jax.block_until_ready(out)

    ref = ref_forward(params, ids, seg, mask, N_HEADS)
    np.testing.assert_allclose(np.asarray(out), np.asarray(ref),
                               rtol=2e-2, atol=2e-2)
    print("KERNEL_OK")
</pallas_src>

<mosaic_0001>
module attributes {stable_mosaic.version = 11 : i64} {
  func.func @kcopy(%arg0: i32, %arg1: memref<8x128xf32, #tpu.memory_space<vmem>>, %arg2: memref<8x128xf32, #tpu.memory_space<vmem>>) attributes {dimension_semantics = [#tpu.dimension_semantics<arbitrary>], iteration_bounds = array<i64: 2>, scalar_prefetch = 0 : i64, scratch_operands = 0 : i64, tpu.core_type = #tpu.core_type<tc>, window_params = [{pipeline_mode = #tpu.pipeline_mode<synchronous>, transform_indices = @transform_0, window_bounds = array<i64: 8, 128>}, {transform_indices = @transform_1, window_bounds = array<i64: 8, 128>}]} {
    %c0 = arith.constant 0 : index
    %c0_0 = arith.constant 0 : index
    %0 = vector.load %arg1[%c0, %c0_0] : memref<8x128xf32, #tpu.memory_space<vmem>>, vector<8x128xf32>
    %cst = arith.constant 1.000000e+00 : f32
    %1 = vector.broadcast %cst : f32 to vector<8x128xf32>
    %2 = arith.addf %0, %1 : vector<8x128xf32>
    %c0_1 = arith.constant 0 : index
    %c0_2 = arith.constant 0 : index
    %3 = vector.load %arg2[%c0_1, %c0_2] : memref<8x128xf32, #tpu.memory_space<vmem>>, vector<8x128xf32>
    tpu.vector_store %arg2[%c0_1, %c0_2], %2 {strides = array<i32>} : memref<8x128xf32, #tpu.memory_space<vmem>>, vector<8x128xf32>,
    return
  }
  func.func @transform_0(%arg0: i32) -> (i32, i32) {
    %c0_i32 = arith.constant 0 : i32
    %c0_i32_0 = arith.constant 0 : i32
    %c0_i32_1 = arith.constant 0 : i32
    return %c0_i32, %c0_i32_0 : i32, i32
  }
  func.func @transform_1(%arg0: i32) -> (i32, i32) {
    %c0_i32 = arith.constant 0 : i32
    %c0_i32_0 = arith.constant 0 : i32
    return %arg0, %c0_i32 : i32, i32
  }
}

module attributes {stable_mosaic.version = 11 : i64} {
  func.func @_qkv_kernel(%arg0: i32, %arg1: i32, %arg2: memref<1x8x32xf32, #tpu.memory_space<vmem>>, %arg3: memref<32x96xbf16, #tpu.memory_space<vmem>>, %arg4: memref<1x96xf32, #tpu.memory_space<vmem>>, %arg5: memref<1x4x8x8xbf16, #tpu.memory_space<vmem>>, %arg6: memref<1x4x8x8xbf16, #tpu.memory_space<vmem>>, %arg7: memref<1x4x8x8xbf16, #tpu.memory_space<vmem>>) attributes {dimension_semantics = [#tpu.dimension_semantics<parallel>, #tpu.dimension_semantics<parallel>], iteration_bounds = array<i64: 2, 1>, scalar_prefetch = 0 : i64, scratch_operands = 0 : i64, tpu.core_type = #tpu.core_type<tc>, window_params = [{transform_indices = @transform_0, window_bounds = array<i64: 1, 8, 32>}, {pipeline_mode = #tpu.pipeline_mode<synchronous>, transform_indices = @transform_1, window_bounds = array<i64: 32, 96>}, {pipeline_mode = #tpu.pipeline_mode<synchronous>, transform_indices = @transform_2, window_bounds = array<i64: 1, 96>}, {transform_indices = @transform_3, window_bounds = array<i64: 1, 4, 8, 8>}, {transform_indices = @transform_4, window_bounds = array<i64: 1, 4, 8, 8>}, {transform_indices = @transform_5, window_bounds = array<i64: 1, 4, 8, 8>}]} {
    %c0 = arith.constant 0 : index
    %c0_0 = arith.constant 0 : index
    %c0_1 = arith.constant 0 : index
    %0 = vector.load %arg2[%c0, %c0_0, %c0_1] : memref<1x8x32xf32, #tpu.memory_space<vmem>>, vector<1x8x32xf32>
    %1 = vector.shape_cast %0 : vector<1x8x32xf32> to vector<8x32xf32>
    %2 = arith.truncf %1 : vector<8x32xf32> to vector<8x32xbf16>
    %c0_2 = arith.constant 0 : index
    %c0_3 = arith.constant 0 : index
    %3 = vector.load %arg3[%c0_2, %c0_3] : memref<32x96xbf16, #tpu.memory_space<vmem>>, vector<32x96xbf16>
    %cst = arith.constant dense<0.000000e+00> : vector<8x96xf32>
    %4 = tpu.matmul %2, %3, %cst {dimension_numbers = #tpu.dot_dimension_numbers<[1], [0], [0], [1], [0, 0, 1, 1], [], []>} : vector<8x32xbf16>, vector<32x96xbf16>, vector<8x96xf32> -> vector<8x96xf32>
    %c0_4 = arith.constant 0 : index
    %c0_5 = arith.constant 0 : index
    %5 = vector.load %arg4[%c0_4, %c0_5] : memref<1x96xf32, #tpu.memory_space<vmem>>, vector<1x96xf32>
    %6 = vector.broadcast %5 : vector<1x96xf32> to vector<8x96xf32>
    %7 = arith.addf %4, %6 : vector<8x96xf32>
    %8 = vector.extract_strided_slice %7 {offsets = [0, 0], sizes = [8, 8], strides = [1, 1]} : vector<8x96xf32> to vector<8x8xf32>
    %9 = vector.extract_strided_slice %7 {offsets = [0, 8], sizes = [8, 8], strides = [1, 1]} : vector<8x96xf32> to vector<8x8xf32>
    %10 = vector.extract_strided_slice %7 {offsets = [0, 16], sizes = [8, 8], strides = [1, 1]} : vector<8x96xf32> to vector<8x8xf32>
    %11 = vector.extract_strided_slice %7 {offsets = [0, 24], sizes = [8, 8], strides = [1, 1]} : vector<8x96xf32> to vector<8x8xf32>
    %12 = vector.shape_cast %8 : vector<8x8xf32> to vector<1x8x8xf32>
    %13 = vector.shape_cast %9 : vector<8x8xf32> to vector<1x8x8xf32>
    %14 = vector.shape_cast %10 : vector<8x8xf32> to vector<1x8x8xf32>
    %15 = vector.shape_cast %11 : vector<8x8xf32> to vector<1x8x8xf32>
    %16 = tpu.concatenate %12, %13, %14, %15 in 0 : vector<1x8x8xf32>, vector<1x8x8xf32>, vector<1x8x8xf32>, vector<1x8x8xf32> -> vector<4x8x8xf32>
    %17 = arith.truncf %16 : vector<4x8x8xf32> to vector<4x8x8xbf16>
    %c0_6 = arith.constant 0 : index
    %c0_7 = arith.constant 0 : index
    %c0_8 = arith.constant 0 : index
    %c0_9 = arith.constant 0 : index
    %18 = vector.load %arg5[%c0_6, %c0_7, %c0_8, %c0_9] : memref<1x4x8x8xbf16, #tpu.memory_space<vmem>>, vector<1x4x8x8xbf16>
    %19 = vector.shape_cast %18 : vector<1x4x8x8xbf16> to vector<4x8x8xbf16>
    %20 = vector.shape_cast %17 : vector<4x8x8xbf16> to vector<1x4x8x8xbf16>
    tpu.vector_store %arg5[%c0_6, %c0_7, %c0_8, %c0_9], %20 {strides = array<i32>} : memref<1x4x8x8xbf16, #tpu.memory_space<vmem>>, vector<1x4x8x8xbf16>,
    %21 = vector.extract_strided_slice %7 {offsets = [0, 32], sizes = [8, 8], strides = [1, 1]} : vector<8x96xf32> to vector<8x8xf32>
    %22 = vector.extract_strided_slice %7 {offsets = [0, 40], sizes = [8, 8], strides = [1, 1]} : vector<8x96xf32> to vector<8x8xf32>
    %23 = vector.extract_strided_slice %7 {offsets = [0, 48], sizes = [8, 8], strides = [1, 1]} : vector<8x96xf32> to vector<8x8xf32>
    %24 = vector.extract_strided_slice %7 {offsets = [0, 56], sizes = [8, 8], strides = [1, 1]} : vector<8x96xf32> to vector<8x8xf32>
    %25 = vector.shape_cast %21 : vector<8x8xf32> to vector<1x8x8xf32>
    %26 = vector.shape_cast %22 : vector<8x8xf32> to vector<1x8x8xf32>
    %27 = vector.shape_cast %23 : vector<8x8xf32> to vector<1x8x8xf32>
    %28 = vector.shape_cast %24 : vector<8x8xf32> to vector<1x8x8xf32>
    %29 = tpu.concatenate %25, %26, %27, %28 in 0 : vector<1x8x8xf32>, vector<1x8x8xf32>, vector<1x8x8xf32>, vector<1x8x8xf32> -> vector<4x8x8xf32>
    %30 = arith.truncf %29 : vector<4x8x8xf32> to vector<4x8x8xbf16>
    %c0_10 = arith.constant 0 : index
    %c0_11 = arith.constant 0 : index
    %c0_12 = arith.constant 0 : index
    %c0_13 = arith.constant 0 : index
    %31 = vector.load %arg6[%c0_10, %c0_11, %c0_12, %c0_13] : memref<1x4x8x8xbf16, #tpu.memory_space<vmem>>, vector<1x4x8x8xbf16>
    %32 = vector.shape_cast %31 : vector<1x4x8x8xbf16> to vector<4x8x8xbf16>
    %33 = vector.shape_cast %30 : vector<4x8x8xbf16> to vector<1x4x8x8xbf16>
    tpu.vector_store %arg6[%c0_10, %c0_11, %c0_12, %c0_13], %33 {strides = array<i32>} : memref<1x4x8x8xbf16, #tpu.memory_space<vmem>>, vector<1x4x8x8xbf16>,
    %34 = vector.extract_strided_slice %7 {offsets = [0, 64], sizes = [8, 8], strides = [1, 1]} : vector<8x96xf32> to vector<8x8xf32>
    %35 = vector.extract_strided_slice %7 {offsets = [0, 72], sizes = [8, 8], strides = [1, 1]} : vector<8x96xf32> to vector<8x8xf32>
    %36 = vector.extract_strided_slice %7 {offsets = [0, 80], sizes = [8, 8], strides = [1, 1]} : vector<8x96xf32> to vector<8x8xf32>
    %37 = vector.extract_strided_slice %7 {offsets = [0, 88], sizes = [8, 8], strides = [1, 1]} : vector<8x96xf32> to vector<8x8xf32>
    %38 = vector.shape_cast %34 : vector<8x8xf32> to vector<1x8x8xf32>
    %39 = vector.shape_cast %35 : vector<8x8xf32> to vector<1x8x8xf32>
    %40 = vector.shape_cast %36 : vector<8x8xf32> to vector<1x8x8xf32>
    %41 = vector.shape_cast %37 : vector<8x8xf32> to vector<1x8x8xf32>
    %42 = tpu.concatenate %38, %39, %40, %41 in 0 : vector<1x8x8xf32>, vector<1x8x8xf32>, vector<1x8x8xf32>, vector<1x8x8xf32> -> vector<4x8x8xf32>
    %43 = arith.truncf %42 : vector<4x8x8xf32> to vector<4x8x8xbf16>
    %c0_14 = arith.constant 0 : index
    %c0_15 = arith.constant 0 : index
    %c0_16 = arith.constant 0 : index
    %c0_17 = arith.constant 0 : index
    %44 = vector.load %arg7[%c0_14, %c0_15, %c0_16, %c0_17] : memref<1x4x8x8xbf16, #tpu.memory_space<vmem>>, vector<1x4x8x8xbf16>
    %45 = vector.shape_cast %44 : vector<1x4x8x8xbf16> to vector<4x8x8xbf16>
    %46 = vector.shape_cast %43 : vector<4x8x8xbf16> to vector<1x4x8x8xbf16>
    tpu.vector_store %arg7[%c0_14, %c0_15, %c0_16, %c0_17], %46 {strides = array<i32>} : memref<1x4x8x8xbf16, #tpu.memory_space<vmem>>, vector<1x4x8x8xbf16>,
    return
  }
  func.func @transform_0(%arg0: i32, %arg1: i32) -> (i32, i32, i32) {
    %c0_i32 = arith.constant 0 : i32
    %c0_i32_0 = arith.constant 0 : i32
    return %arg0, %arg1, %c0_i32 : i32, i32, i32
  }
  func.func @transform_1(%arg0: i32, %arg1: i32) -> (i32, i32) {
    %c0_i32 = arith.constant 0 : i32
    %c0_i32_0 = arith.constant 0 : i32
    %c0_i32_1 = arith.constant 0 : i32
    return %c0_i32, %c0_i32_0 : i32, i32
  }
  func.func @transform_2(%arg0: i32, %arg1: i32) -> (i32, i32) {
    %c0_i32 = arith.constant 0 : i32
    %c0_i32_0 = arith.constant 0 : i32
    %c0_i32_1 = arith.constant 0 : i32
    return %c0_i32, %c0_i32_0 : i32, i32
  }
  func.func @transform_3(%arg0: i32, %arg1: i32) -> (i32, i32, i32, i32) {
    %c0_i32 = arith.constant 0 : i32
    %c0_i32_0 = arith.constant 0 : i32
    %c0_i32_1 = arith.constant 0 : i32
    return %arg0, %c0_i32, %arg1, %c0_i32_0 : i32, i32, i32, i32
  }
  func.func @transform_4(%arg0: i32, %arg1: i32) -> (i32, i32, i32, i32) {
    %c0_i32 = arith.constant 0 : i32
    %c0_i32_0 = arith.constant 0 : i32
    %c0_i32_1 = arith.constant 0 : i32
    return %arg0, %c0_i32, %arg1, %c0_i32_0 : i32, i32, i32, i32
  }
  func.func @transform_5(%arg0: i32, %arg1: i32) -> (i32, i32, i32, i32) {
    %c0_i32 = arith.constant 0 : i32
    %c0_i32_0 = arith.constant 0 : i32
    %c0_i32_1 = arith.constant 0 : i32
    return %arg0, %c0_i32, %arg1, %c0_i32_0 : i32, i32, i32, i32
  }
}

module attributes {stable_mosaic.version = 11 : i64} {
  func.func @_embed_ln_kernel(%arg0: i32, %arg1: i32, %arg2: memref<1x8x32xf32, #tpu.memory_space<vmem>>, %arg3: memref<1x32xf32, #tpu.memory_space<vmem>>, %arg4: memref<1x32xf32, #tpu.memory_space<vmem>>, %arg5: memref<1x8x32xf32, #tpu.memory_space<vmem>>) attributes {dimension_semantics = [#tpu.dimension_semantics<parallel>, #tpu.dimension_semantics<parallel>], iteration_bounds = array<i64: 2, 1>, scalar_prefetch = 0 : i64, scratch_operands = 0 : i64, tpu.core_type = #tpu.core_type<tc>, window_params = [{transform_indices = @transform_0, window_bounds = array<i64: 1, 8, 32>}, {pipeline_mode = #tpu.pipeline_mode<synchronous>, transform_indices = @transform_1, window_bounds = array<i64: 1, 32>}, {pipeline_mode = #tpu.pipeline_mode<synchronous>, transform_indices = @transform_2, window_bounds = array<i64: 1, 32>}, {transform_indices = @transform_3, window_bounds = array<i64: 1, 8, 32>}]} {
    %c0 = arith.constant 0 : index
    %c0_0 = arith.constant 0 : index
    %c0_1 = arith.constant 0 : index
    %0 = vector.load %arg2[%c0, %c0_0, %c0_1] : memref<1x8x32xf32, #tpu.memory_space<vmem>>, vector<1x8x32xf32>
    %c0_2 = arith.constant 0 : index
    %c0_3 = arith.constant 0 : index
    %1 = vector.load %arg3[%c0_2, %c0_3] : memref<1x32xf32, #tpu.memory_space<vmem>>, vector<1x32xf32>
    %c0_4 = arith.constant 0 : index
    %c0_5 = arith.constant 0 : index
    %2 = vector.load %arg4[%c0_4, %c0_5] : memref<1x32xf32, #tpu.memory_space<vmem>>, vector<1x32xf32>
    %cst = arith.constant dense<0.000000e+00> : vector<1x8xf32>
    %3 = vector.multi_reduction <add>, %0, %cst [2] : vector<1x8x32xf32> to vector<1x8xf32>
    %4 = vector.shape_cast %3 : vector<1x8xf32> to vector<1x8x1xf32>
    %cst_6 = arith.constant 3.200000e+01 : f32
    %5 = vector.broadcast %cst_6 : f32 to vector<1x8x1xf32>
    %6 = arith.divf %4, %5 : vector<1x8x1xf32>
    %7 = vector.broadcast %6 : vector<1x8x1xf32> to vector<1x8x32xf32>
    %8 = arith.subf %0, %7 : vector<1x8x32xf32>
    %9 = arith.mulf %8, %8 : vector<1x8x32xf32>
    %cst_7 = arith.constant dense<0.000000e+00> : vector<1x8xf32>
    %10 = vector.multi_reduction <add>, %9, %cst_7 [2] : vector<1x8x32xf32> to vector<1x8xf32>
    %11 = vector.shape_cast %10 : vector<1x8xf32> to vector<1x8x1xf32>
    %cst_8 = arith.constant 3.200000e+01 : f32
    %12 = vector.broadcast %cst_8 : f32 to vector<1x8x1xf32>
    %13 = arith.divf %11, %12 : vector<1x8x1xf32>
    %14 = vector.broadcast %6 : vector<1x8x1xf32> to vector<1x8x32xf32>
    %15 = arith.subf %0, %14 : vector<1x8x32xf32>
    %cst_9 = arith.constant 9.99999996E-13 : f32
    %16 = vector.broadcast %cst_9 : f32 to vector<1x8x1xf32>
    %17 = arith.addf %13, %16 : vector<1x8x1xf32>
    %18 = math.rsqrt %17 : vector<1x8x1xf32>
    %19 = vector.broadcast %18 : vector<1x8x1xf32> to vector<1x8x32xf32>
    %20 = arith.mulf %15, %19 : vector<1x8x32xf32>
    %21 = vector.shape_cast %1 : vector<1x32xf32> to vector<1x1x32xf32>
    %22 = vector.broadcast %21 : vector<1x1x32xf32> to vector<1x8x32xf32>
    %23 = arith.mulf %22, %20 : vector<1x8x32xf32>
    %24 = vector.shape_cast %2 : vector<1x32xf32> to vector<1x1x32xf32>
    %25 = vector.broadcast %24 : vector<1x1x32xf32> to vector<1x8x32xf32>
    %26 = arith.addf %23, %25 : vector<1x8x32xf32>
    %c0_10 = arith.constant 0 : index
    %c0_11 = arith.constant 0 : index
    %c0_12 = arith.constant 0 : index
    %27 = vector.load %arg5[%c0_10, %c0_11, %c0_12] : memref<1x8x32xf32, #tpu.memory_space<vmem>>, vector<1x8x32xf32>
    tpu.vector_store %arg5[%c0_10, %c0_11, %c0_12], %26 {strides = array<i32>} : memref<1x8x32xf32, #tpu.memory_space<vmem>>, vector<1x8x32xf32>,
    return
  }
  func.func @transform_0(%arg0: i32, %arg1: i32) -> (i32, i32, i32) {
    %c0_i32 = arith.constant 0 : i32
    %c0_i32_0 = arith.constant 0 : i32
    return %arg0, %arg1, %c0_i32 : i32, i32, i32
  }
  func.func @transform_1(%arg0: i32, %arg1: i32) -> (i32, i32) {
    %c0_i32 = arith.constant 0 : i32
    %c0_i32_0 = arith.constant 0 : i32
    %c0_i32_1 = arith.constant 0 : i32
    return %c0_i32, %c0_i32_0 : i32, i32
  }
  func.func @transform_2(%arg0: i32, %arg1: i32) -> (i32, i32) {
    %c0_i32 = arith.constant 0 : i32
    %c0_i32_0 = arith.constant 0 : i32
    %c0_i32_1 = arith.constant 0 : i32
    return %c0_i32, %c0_i32_0 : i32, i32
  }
  func.func @transform_3(%arg0: i32, %arg1: i32) -> (i32, i32, i32) {
    %c0_i32 = arith.constant 0 : i32
    %c0_i32_0 = arith.constant 0 : i32
    return %arg0, %arg1, %c0_i32 : i32, i32, i32
  }
}

module attributes {stable_mosaic.version = 11 : i64} {
  func.func @_flash_kernel(%arg0: i32, %arg1: i32, %arg2: i32, %arg3: memref<1x4x8x8xbf16, #tpu.memory_space<vmem>>, %arg4: memref<1x4x8x8xbf16, #tpu.memory_space<vmem>>, %arg5: memref<1x4x8x8xbf16, #tpu.memory_space<vmem>>, %arg6: memref<1x1x8xf32, #tpu.memory_space<vmem>>, %arg7: memref<1x8x32xbf16, #tpu.memory_space<vmem>>, %arg8: memref<4x8x1xf32, #tpu.memory_space<vmem>>, %arg9: memref<4x8x1xf32, #tpu.memory_space<vmem>>, %arg10: memref<4x8x8xf32, #tpu.memory_space<vmem>>) attributes {dimension_semantics = [#tpu.dimension_semantics<parallel>, #tpu.dimension_semantics<parallel>, #tpu.dimension_semantics<arbitrary>], iteration_bounds = array<i64: 2, 1, 1>, scalar_prefetch = 0 : i64, scratch_operands = 3 : i64, tpu.core_type = #tpu.core_type<tc>, window_params = [{transform_indices = @transform_0, window_bounds = array<i64: 1, 4, 8, 8>}, {transform_indices = @transform_1, window_bounds = array<i64: 1, 4, 8, 8>}, {transform_indices = @transform_2, window_bounds = array<i64: 1, 4, 8, 8>}, {transform_indices = @transform_3, window_bounds = array<i64: 1, 1, 8>}, {transform_indices = @transform_4, window_bounds = array<i64: 1, 8, 32>}]} {
    %c0_i32 = arith.constant 0 : i32
    %0 = arith.cmpi eq, %arg2, %c0_i32 : i32
    %1 = arith.extui %0 : i1 to i32
    %c0_i32_0 = arith.constant 0 : i32
    %2 = arith.cmpi ne, %1, %c0_i32_0 : i32
    scf.if %2 {
      %cst_38 = arith.constant 0xFF800000 : f32
      %41 = vector.broadcast %cst_38 : f32 to vector<4x8x1xf32>
      %c0_39 = arith.constant 0 : index
      %c0_40 = arith.constant 0 : index
      %c0_41 = arith.constant 0 : index
      %42 = vector.load %arg8[%c0_39, %c0_40, %c0_41] : memref<4x8x1xf32, #tpu.memory_space<vmem>>, vector<4x8x1xf32>
      tpu.vector_store %arg8[%c0_39, %c0_40, %c0_41], %41 {strides = array<i32>} : memref<4x8x1xf32, #tpu.memory_space<vmem>>, vector<4x8x1xf32>,
      %cst_42 = arith.constant 0.000000e+00 : f32
      %43 = vector.broadcast %cst_42 : f32 to vector<4x8x1xf32>
      %c0_43 = arith.constant 0 : index
      %c0_44 = arith.constant 0 : index
      %c0_45 = arith.constant 0 : index
      %44 = vector.load %arg9[%c0_43, %c0_44, %c0_45] : memref<4x8x1xf32, #tpu.memory_space<vmem>>, vector<4x8x1xf32>
      tpu.vector_store %arg9[%c0_43, %c0_44, %c0_45], %43 {strides = array<i32>} : memref<4x8x1xf32, #tpu.memory_space<vmem>>, vector<4x8x1xf32>,
      %cst_46 = arith.constant 0.000000e+00 : f32
      %45 = vector.broadcast %cst_46 : f32 to vector<4x8x8xf32>
      %c0_47 = arith.constant 0 : index
      %c0_48 = arith.constant 0 : index
      %c0_49 = arith.constant 0 : index
      %46 = vector.load %arg10[%c0_47, %c0_48, %c0_49] : memref<4x8x8xf32, #tpu.memory_space<vmem>>, vector<4x8x8xf32>
      tpu.vector_store %arg10[%c0_47, %c0_48, %c0_49], %45 {strides = array<i32>} : memref<4x8x8xf32, #tpu.memory_space<vmem>>, vector<4x8x8xf32>,
    } else {
    }
    %c0 = arith.constant 0 : index
    %c0_1 = arith.constant 0 : index
    %c0_2 = arith.constant 0 : index
    %c0_3 = arith.constant 0 : index
    %3 = vector.load %arg3[%c0, %c0_1, %c0_2, %c0_3] : memref<1x4x8x8xbf16, #tpu.memory_space<vmem>>, vector<1x4x8x8xbf16>
    %4 = vector.shape_cast %3 : vector<1x4x8x8xbf16> to vector<4x8x8xbf16>
    %c0_4 = arith.constant 0 : index
    %c0_5 = arith.constant 0 : index
    %c0_6 = arith.constant 0 : index
    %c0_7 = arith.constant 0 : index
    %5 = vector.load %arg4[%c0_4, %c0_5, %c0_6, %c0_7] : memref<1x4x8x8xbf16, #tpu.memory_space<vmem>>, vector<1x4x8x8xbf16>
    %6 = vector.shape_cast %5 : vector<1x4x8x8xbf16> to vector<4x8x8xbf16>
    %c0_8 = arith.constant 0 : index
    %c0_9 = arith.constant 0 : index
    %c0_10 = arith.constant 0 : index
    %c0_11 = arith.constant 0 : index
    %7 = vector.load %arg5[%c0_8, %c0_9, %c0_10, %c0_11] : memref<1x4x8x8xbf16, #tpu.memory_space<vmem>>, vector<1x4x8x8xbf16>
    %8 = vector.shape_cast %7 : vector<1x4x8x8xbf16> to vector<4x8x8xbf16>
    "tpu.trace_start"() <{level = 10 : i32, message = "hqd,hkd->hqk"}> : () -> ()
    %cst = arith.constant dense<0.000000e+00> : vector<4x8x8xf32>
    %9 = tpu.matmul %4, %6, %cst {dimension_numbers = #tpu.dot_dimension_numbers<[2], [2], [1], [1], [0, 0, 0, 1, 1, 1], [0], [0]>} : vector<4x8x8xbf16>, vector<4x8x8xbf16>, vector<4x8x8xf32> -> vector<4x8x8xf32>
    "tpu.trace_stop"() : () -> ()
    %c0_12 = arith.constant 0 : index
    %c0_13 = arith.constant 0 : index
    %c0_14 = arith.constant 0 : index
    %10 = vector.load %arg6[%c0_12, %c0_13, %c0_14] : memref<1x1x8xf32, #tpu.memory_space<vmem>>, vector<1x1x8xf32>
    %11 = vector.shape_cast %10 : vector<1x1x8xf32> to vector<1x8xf32>
    %12 = vector.shape_cast %11 : vector<1x8xf32> to vector<1x1x8xf32>
    %13 = vector.broadcast %12 : vector<1x1x8xf32> to vector<4x8x8xf32>
    %14 = arith.addf %9, %13 : vector<4x8x8xf32>
    %c0_15 = arith.constant 0 : index
    %c0_16 = arith.constant 0 : index
    %c0_17 = arith.constant 0 : index
    %15 = vector.load %arg8[%c0_15, %c0_16, %c0_17] : memref<4x8x1xf32, #tpu.memory_space<vmem>>, vector<4x8x1xf32>
    %cst_18 = arith.constant dense<0xFF800000> : vector<4x8xf32>
    %16 = vector.multi_reduction <maximumf>, %14, %cst_18 [2] : vector<4x8x8xf32> to vector<4x8xf32>
    %17 = vector.shape_cast %16 : vector<4x8xf32> to vector<4x8x1xf32>
    %18 = arith.maximumf %15, %17 : vector<4x8x1xf32>
    %19 = arith.subf %15, %18 : vector<4x8x1xf32>
    %20 = math.exp %19 : vector<4x8x1xf32>
    %21 = vector.broadcast %18 : vector<4x8x1xf32> to vector<4x8x8xf32>
    %22 = arith.subf %14, %21 : vector<4x8x8xf32>
    %23 = math.exp %22 : vector<4x8x8xf32>
    %c0_19 = arith.constant 0 : index
    %c0_20 = arith.constant 0 : index
    %c0_21 = arith.constant 0 : index
    %24 = vector.load %arg9[%c0_19, %c0_20, %c0_21] : memref<4x8x1xf32, #tpu.memory_space<vmem>>, vector<4x8x1xf32>
    %25 = arith.mulf %20, %24 : vector<4x8x1xf32>
    %cst_22 = arith.constant dense<0.000000e+00> : vector<4x8xf32>
    %26 = vector.multi_reduction <add>, %23, %cst_22 [2] : vector<4x8x8xf32> to vector<4x8xf32>
    %27 = vector.shape_cast %26 : vector<4x8xf32> to vector<4x8x1xf32>
    %28 = arith.addf %25, %27 : vector<4x8x1xf32>
    %c0_23 = arith.constant 0 : index
    %c0_24 = arith.constant 0 : index
    %c0_25 = arith.constant 0 : index
    %29 = vector.load %arg9[%c0_23, %c0_24, %c0_25] : memref<4x8x1xf32, #tpu.memory_space<vmem>>, vector<4x8x1xf32>
    tpu.vector_store %arg9[%c0_23, %c0_24, %c0_25], %28 {strides = array<i32>} : memref<4x8x1xf32, #tpu.memory_space<vmem>>, vector<4x8x1xf32>,
    %c0_26 = arith.constant 0 : index
    %c0_27 = arith.constant 0 : index
    %c0_28 = arith.constant 0 : index
    %30 = vector.load %arg10[%c0_26, %c0_27, %c0_28] : memref<4x8x8xf32, #tpu.memory_space<vmem>>, vector<4x8x8xf32>
    %31 = vector.broadcast %20 : vector<4x8x1xf32> to vector<4x8x8xf32>
    %32 = arith.mulf %31, %30 : vector<4x8x8xf32>
    %33 = arith.truncf %23 : vector<4x8x8xf32> to vector<4x8x8xbf16>
    "tpu.trace_start"() <{level = 10 : i32, message = "hqk,hkd->hqd"}> : () -> ()
    %cst_29 = arith.constant dense<0.000000e+00> : vector<4x8x8xf32>
    %34 = tpu.matmul %33, %8, %cst_29 {dimension_numbers = #tpu.dot_dimension_numbers<[2], [1], [1], [2], [0, 0, 0, 1, 1, 2], [0], [0]>} : vector<4x8x8xbf16>, vector<4x8x8xbf16>, vector<4x8x8xf32> -> vector<4x8x8xf32>
    "tpu.trace_stop"() : () -> ()
    %35 = arith.addf %32, %34 : vector<4x8x8xf32>
    %c0_30 = arith.constant 0 : index
    %c0_31 = arith.constant 0 : index
    %c0_32 = arith.constant 0 : index
    %36 = vector.load %arg10[%c0_30, %c0_31, %c0_32] : memref<4x8x8xf32, #tpu.memory_space<vmem>>, vector<4x8x8xf32>
    tpu.vector_store %arg10[%c0_30, %c0_31, %c0_32], %35 {strides = array<i32>} : memref<4x8x8xf32, #tpu.memory_space<vmem>>, vector<4x8x8xf32>,
    %c0_33 = arith.constant 0 : index
    %c0_34 = arith.constant 0 : index
    %c0_35 = arith.constant 0 : index
    %37 = vector.load %arg8[%c0_33, %c0_34, %c0_35] : memref<4x8x1xf32, #tpu.memory_space<vmem>>, vector<4x8x1xf32>
    tpu.vector_store %arg8[%c0_33, %c0_34, %c0_35], %18 {strides = array<i32>} : memref<4x8x1xf32, #tpu.memory_space<vmem>>, vector<4x8x1xf32>,
    %c0_i32_36 = arith.constant 0 : i32
    %38 = arith.cmpi eq, %arg2, %c0_i32_36 : i32
    %39 = arith.extui %38 : i1 to i32
    %c0_i32_37 = arith.constant 0 : i32
    %40 = arith.cmpi ne, %39, %c0_i32_37 : i32
    scf.if %40 {
      %c0_38 = arith.constant 0 : index
      %c0_39 = arith.constant 0 : index
      %c0_40 = arith.constant 0 : index
      %41 = vector.load %arg10[%c0_38, %c0_39, %c0_40] : memref<4x8x8xf32, #tpu.memory_space<vmem>>, vector<4x8x8xf32>
      %c0_41 = arith.constant 0 : index
      %c0_42 = arith.constant 0 : index
      %c0_43 = arith.constant 0 : index
      %42 = vector.load %arg9[%c0_41, %c0_42, %c0_43] : memref<4x8x1xf32, #tpu.memory_space<vmem>>, vector<4x8x1xf32>
      %43 = tpu.reciprocal %42 {approx = true} : vector<4x8x1xf32> -> vector<4x8x1xf32>
      %44 = vector.broadcast %43 : vector<4x8x1xf32> to vector<4x8x8xf32>
      %45 = arith.mulf %41, %44 : vector<4x8x8xf32>
      %46 = vector.extract_strided_slice %45 {offsets = [0, 0, 0], sizes = [1, 8, 8], strides = [1, 1, 1]} : vector<4x8x8xf32> to vector<1x8x8xf32>
      %47 = vector.shape_cast %46 : vector<1x8x8xf32> to vector<8x8xf32>
      %48 = vector.extract_strided_slice %45 {offsets = [1, 0, 0], sizes = [1, 8, 8], strides = [1, 1, 1]} : vector<4x8x8xf32> to vector<1x8x8xf32>
      %49 = vector.shape_cast %48 : vector<1x8x8xf32> to vector<8x8xf32>
      %50 = vector.extract_strided_slice %45 {offsets = [2, 0, 0], sizes = [1, 8, 8], strides = [1, 1, 1]} : vector<4x8x8xf32> to vector<1x8x8xf32>
      %51 = vector.shape_cast %50 : vector<1x8x8xf32> to vector<8x8xf32>
      %52 = vector.extract_strided_slice %45 {offsets = [3, 0, 0], sizes = [1, 8, 8], strides = [1, 1, 1]} : vector<4x8x8xf32> to vector<1x8x8xf32>
      %53 = vector.shape_cast %52 : vector<1x8x8xf32> to vector<8x8xf32>
      %54 = tpu.concatenate %47, %49, %51, %53 in 1 : vector<8x8xf32>, vector<8x8xf32>, vector<8x8xf32>, vector<8x8xf32> -> vector<8x32xf32>
      %55 = arith.truncf %54 : vector<8x32xf32> to vector<8x32xbf16>
      %c0_44 = arith.constant 0 : index
      %c0_45 = arith.constant 0 : index
      %c0_46 = arith.constant 0 : index
      %56 = vector.load %arg7[%c0_44, %c0_45, %c0_46] : memref<1x8x32xbf16, #tpu.memory_space<vmem>>, vector<1x8x32xbf16>
      %57 = vector.shape_cast %56 : vector<1x8x32xbf16> to vector<8x32xbf16>
      %58 = vector.shape_cast %55 : vector<8x32xbf16> to vector<1x8x32xbf16>
      tpu.vector_store %arg7[%c0_44, %c0_45, %c0_46], %58 {strides = array<i32>} : memref<1x8x32xbf16, #tpu.memory_space<vmem>>, vector<1x8x32xbf16>,
    } else {
    }
    return
  }
  func.func @transform_0(%arg0: i32, %arg1: i32, %arg2: i32) -> (i32, i32, i32, i32) {
    %c0_i32 = arith.constant 0 : i32
    %c0_i32_0 = arith.constant 0 : i32
    %c0_i32_1 = arith.constant 0 : i32
    return %arg0, %c0_i32, %arg1, %c0_i32_0 : i32, i32, i32, i32
  }
  func.func @transform_1(%arg0: i32, %arg1: i32, %arg2: i32) -> (i32, i32, i32, i32) {
    %c0_i32 = arith.constant 0 : i32
    %c0_i32_0 = arith.constant 0 : i32
    %c0_i32_1 = arith.constant 0 : i32
    return %arg0, %c0_i32, %arg2, %c0_i32_0 : i32, i32, i32, i32
  }
  func.func @transform_2(%arg0: i32, %arg1: i32, %arg2: i32) -> (i32, i32, i32, i32) {
    %c0_i32 = arith.constant 0 : i32
    %c0_i32_0 = arith.constant 0 : i32
    %c0_i32_1 = arith.constant 0 : i32
    return %arg0, %c0_i32, %arg2, %c0_i32_0 : i32, i32, i32, i32
  }
  func.func @transform_3(%arg0: i32, %arg1: i32, %arg2: i32) -> (i32, i32, i32) {
    %c0_i32 = arith.constant 0 : i32
    %c0_i32_0 = arith.constant 0 : i32
    return %arg0, %c0_i32, %arg2 : i32, i32, i32
  }
  func.func @transform_4(%arg0: i32, %arg1: i32, %arg2: i32) -> (i32, i32, i32) {
    %c0_i32 = arith.constant 0 : i32
    %c0_i32_0 = arith.constant 0 : i32
    return %arg0, %arg1, %c0_i32 : i32, i32, i32
  }
}

module attributes {stable_mosaic.version = 11 : i64} {
  func.func @_post_kernel(%arg0: i32, %arg1: i32, %arg2: memref<1x8x32xf32, #tpu.memory_space<vmem>>, %arg3: memref<1x8x32xbf16, #tpu.memory_space<vmem>>, %arg4: memref<32x32xbf16, #tpu.memory_space<vmem>>, %arg5: memref<1x32xf32, #tpu.memory_space<vmem>>, %arg6: memref<1x32xf32, #tpu.memory_space<vmem>>, %arg7: memref<1x32xf32, #tpu.memory_space<vmem>>, %arg8: memref<32x64xbf16, #tpu.memory_space<vmem>>, %arg9: memref<1x64xf32, #tpu.memory_space<vmem>>, %arg10: memref<64x32xbf16, #tpu.memory_space<vmem>>, %arg11: memref<1x32xf32, #tpu.memory_space<vmem>>, %arg12: memref<1x32xf32, #tpu.memory_space<vmem>>, %arg13: memref<1x32xf32, #tpu.memory_space<vmem>>, %arg14: memref<1x8x32xf32, #tpu.memory_space<vmem>>) attributes {dimension_semantics = [#tpu.dimension_semantics<parallel>, #tpu.dimension_semantics<parallel>], iteration_bounds = array<i64: 2, 1>, scalar_prefetch = 0 : i64, scratch_operands = 0 : i64, tpu.core_type = #tpu.core_type<tc>, window_params = [{transform_indices = @transform_0, window_bounds = array<i64: 1, 8, 32>}, {transform_indices = @transform_1, window_bounds = array<i64: 1, 8, 32>}, {pipeline_mode = #tpu.pipeline_mode<synchronous>, transform_indices = @transform_2, window_bounds = array<i64: 32, 32>}, {pipeline_mode = #tpu.pipeline_mode<synchronous>, transform_indices = @transform_3, window_bounds = array<i64: 1, 32>}, {pipeline_mode = #tpu.pipeline_mode<synchronous>, transform_indices = @transform_4, window_bounds = array<i64: 1, 32>}, {pipeline_mode = #tpu.pipeline_mode<synchronous>, transform_indices = @transform_5, window_bounds = array<i64: 1, 32>}, {pipeline_mode = #tpu.pipeline_mode<synchronous>, transform_indices = @transform_6, window_bounds = array<i64: 32, 64>}, {pipeline_mode = #tpu.pipeline_mode<synchronous>, transform_indices = @transform_7, window_bounds = array<i64: 1, 64>}, {pipeline_mode = #tpu.pipeline_mode<synchronous>, transform_indices = @transform_8, window_bounds = array<i64: 64, 32>}, {pipeline_mode = #tpu.pipeline_mode<synchronous>, transform_indices = @transform_9, window_bounds = array<i64: 1, 32>}, {pipeline_mode = #tpu.pipeline_mode<synchronous>, transform_indices = @transform_10, window_bounds = array<i64: 1, 32>}, {pipeline_mode = #tpu.pipeline_mode<synchronous>, transform_indices = @transform_11, window_bounds = array<i64: 1, 32>}, {transform_indices = @transform_12, window_bounds = array<i64: 1, 8, 32>}]} {
    %c0 = arith.constant 0 : index
    %c0_0 = arith.constant 0 : index
    %c0_1 = arith.constant 0 : index
    %0 = vector.load %arg2[%c0, %c0_0, %c0_1] : memref<1x8x32xf32, #tpu.memory_space<vmem>>, vector<1x8x32xf32>
    %1 = vector.shape_cast %0 : vector<1x8x32xf32> to vector<8x32xf32>
    %c0_2 = arith.constant 0 : index
    %c0_3 = arith.constant 0 : index
    %c0_4 = arith.constant 0 : index
    %2 = vector.load %arg3[%c0_2, %c0_3, %c0_4] : memref<1x8x32xbf16, #tpu.memory_space<vmem>>, vector<1x8x32xbf16>
    %3 = vector.shape_cast %2 : vector<1x8x32xbf16> to vector<8x32xbf16>
    %c0_5 = arith.constant 0 : index
    %c0_6 = arith.constant 0 : index
    %4 = vector.load %arg4[%c0_5, %c0_6] : memref<32x32xbf16, #tpu.memory_space<vmem>>, vector<32x32xbf16>
    %cst = arith.constant dense<0.000000e+00> : vector<8x32xf32>
    %5 = tpu.matmul %3, %4, %cst {dimension_numbers = #tpu.dot_dimension_numbers<[1], [0], [0], [1], [0, 0, 1, 1], [], []>} : vector<8x32xbf16>, vector<32x32xbf16>, vector<8x32xf32> -> vector<8x32xf32>
    %c0_7 = arith.constant 0 : index
    %c0_8 = arith.constant 0 : index
    %6 = vector.load %arg5[%c0_7, %c0_8] : memref<1x32xf32, #tpu.memory_space<vmem>>, vector<1x32xf32>
    %7 = vector.broadcast %6 : vector<1x32xf32> to vector<8x32xf32>
    %8 = arith.addf %5, %7 : vector<8x32xf32>
    %9 = arith.addf %1, %8 : vector<8x32xf32>
    %c0_9 = arith.constant 0 : index
    %c0_10 = arith.constant 0 : index
    %10 = vector.load %arg6[%c0_9, %c0_10] : memref<1x32xf32, #tpu.memory_space<vmem>>, vector<1x32xf32>
    %c0_11 = arith.constant 0 : index
    %c0_12 = arith.constant 0 : index
    %11 = vector.load %arg7[%c0_11, %c0_12] : memref<1x32xf32, #tpu.memory_space<vmem>>, vector<1x32xf32>
    %cst_13 = arith.constant dense<0.000000e+00> : vector<8xf32>
    %12 = vector.multi_reduction <add>, %9, %cst_13 [1] : vector<8x32xf32> to vector<8xf32>
    %13 = vector.shape_cast %12 : vector<8xf32> to vector<8x1xf32>
    %cst_14 = arith.constant 3.200000e+01 : f32
    %14 = vector.broadcast %cst_14 : f32 to vector<8x1xf32>
    %15 = arith.divf %13, %14 : vector<8x1xf32>
    %16 = vector.broadcast %15 : vector<8x1xf32> to vector<8x32xf32>
    %17 = arith.subf %9, %16 : vector<8x32xf32>
    %18 = arith.mulf %17, %17 : vector<8x32xf32>
    %cst_15 = arith.constant dense<0.000000e+00> : vector<8xf32>
    %19 = vector.multi_reduction <add>, %18, %cst_15 [1] : vector<8x32xf32> to vector<8xf32>
    %20 = vector.shape_cast %19 : vector<8xf32> to vector<8x1xf32>
    %cst_16 = arith.constant 3.200000e+01 : f32
    %21 = vector.broadcast %cst_16 : f32 to vector<8x1xf32>
    %22 = arith.divf %20, %21 : vector<8x1xf32>
    %23 = vector.broadcast %15 : vector<8x1xf32> to vector<8x32xf32>
    %24 = arith.subf %9, %23 : vector<8x32xf32>
    %cst_17 = arith.constant 9.99999996E-13 : f32
    %25 = vector.broadcast %cst_17 : f32 to vector<8x1xf32>
    %26 = arith.addf %22, %25 : vector<8x1xf32>
    %27 = math.rsqrt %26 : vector<8x1xf32>
    %28 = vector.broadcast %27 : vector<8x1xf32> to vector<8x32xf32>
    %29 = arith.mulf %24, %28 : vector<8x32xf32>
    %30 = vector.broadcast %10 : vector<1x32xf32> to vector<8x32xf32>
    %31 = arith.mulf %30, %29 : vector<8x32xf32>
    %32 = vector.broadcast %11 : vector<1x32xf32> to vector<8x32xf32>
    %33 = arith.addf %31, %32 : vector<8x32xf32>
    %34 = arith.truncf %33 : vector<8x32xf32> to vector<8x32xbf16>
    %c0_18 = arith.constant 0 : index
    %c0_19 = arith.constant 0 : index
    %35 = vector.load %arg8[%c0_18, %c0_19] : memref<32x64xbf16, #tpu.memory_space<vmem>>, vector<32x64xbf16>
    %cst_20 = arith.constant dense<0.000000e+00> : vector<8x64xf32>
    %36 = tpu.matmul %34, %35, %cst_20 {dimension_numbers = #tpu.dot_dimension_numbers<[1], [0], [0], [1], [0, 0, 1, 1], [], []>} : vector<8x32xbf16>, vector<32x64xbf16>, vector<8x64xf32> -> vector<8x64xf32>
    %c0_21 = arith.constant 0 : index
    %c0_22 = arith.constant 0 : index
    %37 = vector.load %arg9[%c0_21, %c0_22] : memref<1x64xf32, #tpu.memory_space<vmem>>, vector<1x64xf32>
    %38 = vector.broadcast %37 : vector<1x64xf32> to vector<8x64xf32>
    %39 = arith.addf %36, %38 : vector<8x64xf32>
    %cst_23 = arith.constant 5.000000e-01 : f32
    %40 = vector.broadcast %cst_23 : f32 to vector<8x64xf32>
    %41 = arith.mulf %40, %39 : vector<8x64xf32>
    %cst_24 = arith.constant 0.707106769 : f32
    %42 = vector.broadcast %cst_24 : f32 to vector<8x64xf32>
    %43 = arith.mulf %39, %42 : vector<8x64xf32>
    %44 = math.absf %43 : vector<8x64xf32>
    %cst_25 = arith.constant 0.327591091 : f32
    %45 = vector.broadcast %cst_25 : f32 to vector<8x64xf32>
    %46 = arith.mulf %45, %44 : vector<8x64xf32>
    %cst_26 = arith.constant 1.000000e+00 : f32
    %47 = vector.broadcast %cst_26 : f32 to vector<8x64xf32>
    %48 = arith.addf %47, %46 : vector<8x64xf32>
    %cst_27 = arith.constant 1.000000e+00 : f32
    %49 = vector.broadcast %cst_27 : f32 to vector<8x64xf32>
    %50 = arith.divf %49, %48 : vector<8x64xf32>
    %cst_28 = arith.constant 1.06140542 : f32
    %51 = vector.broadcast %cst_28 : f32 to vector<8x64xf32>
    %52 = arith.mulf %51, %50 : vector<8x64xf32>
    %cst_29 = arith.constant -1.45315206 : f32
    %53 = vector.broadcast %cst_29 : f32 to vector<8x64xf32>
    %54 = arith.addf %52, %53 : vector<8x64xf32>
    %55 = arith.mulf %54, %50 : vector<8x64xf32>
    %cst_30 = arith.constant 1.42141378 : f32
    %56 = vector.broadcast %cst_30 : f32 to vector<8x64xf32>
    %57 = arith.addf %55, %56 : vector<8x64xf32>
    %58 = arith.mulf %57, %50 : vector<8x64xf32>
    %cst_31 = arith.constant -0.284496725 : f32
    %59 = vector.broadcast %cst_31 : f32 to vector<8x64xf32>
    %60 = arith.addf %58, %59 : vector<8x64xf32>
    %61 = arith.mulf %60, %50 : vector<8x64xf32>
    %cst_32 = arith.constant 0.254829586 : f32
    %62 = vector.broadcast %cst_32 : f32 to vector<8x64xf32>
    %63 = arith.addf %61, %62 : vector<8x64xf32>
    %64 = arith.mulf %63, %50 : vector<8x64xf32>
    %cst_33 = arith.constant 0.000000e+00 : f32
    %65 = vector.broadcast %cst_33 : f32 to vector<8x64xf32>
    %66 = arith.subf %65, %44 : vector<8x64xf32>
    %67 = arith.mulf %66, %44 : vector<8x64xf32>
    %68 = math.exp %67 : vector<8x64xf32>
    %69 = arith.mulf %64, %68 : vector<8x64xf32>
    %cst_34 = arith.constant 1.000000e+00 : f32
    %70 = vector.broadcast %cst_34 : f32 to vector<8x64xf32>
    %71 = arith.subf %70, %69 : vector<8x64xf32>
    %cst_35 = arith.constant 0.000000e+00 : f32
    %72 = vector.broadcast %cst_35 : f32 to vector<8x64xf32>
    %73 = arith.cmpf oge, %43, %72 : vector<8x64xf32>
    %cst_36 = arith.constant 0.000000e+00 : f32
    %74 = vector.broadcast %cst_36 : f32 to vector<8x64xf32>
    %75 = arith.subf %74, %71 : vector<8x64xf32>
    %76 = arith.select %73, %71, %75 : vector<8x64xi1>, vector<8x64xf32>
    %cst_37 = arith.constant 1.000000e+00 : f32
    %77 = vector.broadcast %cst_37 : f32 to vector<8x64xf32>
    %78 = arith.addf %77, %76 : vector<8x64xf32>
    %79 = arith.mulf %41, %78 : vector<8x64xf32>
    %80 = arith.truncf %79 : vector<8x64xf32> to vector<8x64xbf16>
    %c0_38 = arith.constant 0 : index
    %c0_39 = arith.constant 0 : index
    %81 = vector.load %arg10[%c0_38, %c0_39] : memref<64x32xbf16, #tpu.memory_space<vmem>>, vector<64x32xbf16>
    %cst_40 = arith.constant dense<0.000000e+00> : vector<8x32xf32>
    %82 = tpu.matmul %80, %81, %cst_40 {dimension_numbers = #tpu.dot_dimension_numbers<[1], [0], [0], [1], [0, 0, 1, 1], [], []>} : vector<8x64xbf16>, vector<64x32xbf16>, vector<8x32xf32> -> vector<8x32xf32>
    %c0_41 = arith.constant 0 : index
    %c0_42 = arith.constant 0 : index
    %83 = vector.load %arg11[%c0_41, %c0_42] : memref<1x32xf32, #tpu.memory_space<vmem>>, vector<1x32xf32>
    %84 = vector.broadcast %83 : vector<1x32xf32> to vector<8x32xf32>
    %85 = arith.addf %82, %84 : vector<8x32xf32>
    %86 = arith.addf %33, %85 : vector<8x32xf32>
    %c0_43 = arith.constant 0 : index
    %c0_44 = arith.constant 0 : index
    %87 = vector.load %arg12[%c0_43, %c0_44] : memref<1x32xf32, #tpu.memory_space<vmem>>, vector<1x32xf32>
    %c0_45 = arith.constant 0 : index
    %c0_46 = arith.constant 0 : index
    %88 = vector.load %arg13[%c0_45, %c0_46] : memref<1x32xf32, #tpu.memory_space<vmem>>, vector<1x32xf32>
    %cst_47 = arith.constant dense<0.000000e+00> : vector<8xf32>
    %89 = vector.multi_reduction <add>, %86, %cst_47 [1] : vector<8x32xf32> to vector<8xf32>
    %90 = vector.shape_cast %89 : vector<8xf32> to vector<8x1xf32>
    %cst_48 = arith.constant 3.200000e+01 : f32
    %91 = vector.broadcast %cst_48 : f32 to vector<8x1xf32>
    %92 = arith.divf %90, %91 : vector<8x1xf32>
    %93 = vector.broadcast %92 : vector<8x1xf32> to vector<8x32xf32>
    %94 = arith.subf %86, %93 : vector<8x32xf32>
    %95 = arith.mulf %94, %94 : vector<8x32xf32>
    %cst_49 = arith.constant dense<0.000000e+00> : vector<8xf32>
    %96 = vector.multi_reduction <add>, %95, %cst_49 [1] : vector<8x32xf32> to vector<8xf32>
    %97 = vector.shape_cast %96 : vector<8xf32> to vector<8x1xf32>
    %cst_50 = arith.constant 3.200000e+01 : f32
    %98 = vector.broadcast %cst_50 : f32 to vector<8x1xf32>
    %99 = arith.divf %97, %98 : vector<8x1xf32>
    %100 = vector.broadcast %92 : vector<8x1xf32> to vector<8x32xf32>
    %101 = arith.subf %86, %100 : vector<8x32xf32>
    %cst_51 = arith.constant 9.99999996E-13 : f32
    %102 = vector.broadcast %cst_51 : f32 to vector<8x1xf32>
    %103 = arith.addf %99, %102 : vector<8x1xf32>
    %104 = math.rsqrt %103 : vector<8x1xf32>
    %105 = vector.broadcast %104 : vector<8x1xf32> to vector<8x32xf32>
    %106 = arith.mulf %101, %105 : vector<8x32xf32>
    %107 = vector.broadcast %87 : vector<1x32xf32> to vector<8x32xf32>
    %108 = arith.mulf %107, %106 : vector<8x32xf32>
    %109 = vector.broadcast %88 : vector<1x32xf32> to vector<8x32xf32>
    %110 = arith.addf %108, %109 : vector<8x32xf32>
    %c0_52 = arith.constant 0 : index
    %c0_53 = arith.constant 0 : index
    %c0_54 = arith.constant 0 : index
    %111 = vector.load %arg14[%c0_52, %c0_53, %c0_54] : memref<1x8x32xf32, #tpu.memory_space<vmem>>, vector<1x8x32xf32>
    %112 = vector.shape_cast %111 : vector<1x8x32xf32> to vector<8x32xf32>
    %113 = vector.shape_cast %110 : vector<8x32xf32> to vector<1x8x32xf32>
    tpu.vector_store %arg14[%c0_52, %c0_53, %c0_54], %113 {strides = array<i32>} : memref<1x8x32xf32, #tpu.memory_space<vmem>>, vector<1x8x32xf32>,
    return
  }
  func.func @transform_0(%arg0: i32, %arg1: i32) -> (i32, i32, i32) {
    %c0_i32 = arith.constant 0 : i32
    %c0_i32_0 = arith.constant 0 : i32
    return %arg0, %arg1, %c0_i32 : i32, i32, i32
  }
  func.func @transform_1(%arg0: i32, %arg1: i32) -> (i32, i32, i32) {
    %c0_i32 = arith.constant 0 : i32
    %c0_i32_0 = arith.constant 0 : i32
    return %arg0, %arg1, %c0_i32 : i32, i32, i32
  }
  func.func @transform_2(%arg0: i32, %arg1: i32) -> (i32, i32) {
    %c0_i32 = arith.constant 0 : i32
    %c0_i32_0 = arith.constant 0 : i32
    %c0_i32_1 = arith.constant 0 : i32
    return %c0_i32, %c0_i32_0 : i32, i32
  }
  func.func @transform_3(%arg0: i32, %arg1: i32) -> (i32, i32) {
    %c0_i32 = arith.constant 0 : i32
    %c0_i32_0 = arith.constant 0 : i32
    %c0_i32_1 = arith.constant 0 : i32
    return %c0_i32, %c0_i32_0 : i32, i32
  }
  func.func @transform_4(%arg0: i32, %arg1: i32) -> (i32, i32) {
    %c0_i32 = arith.constant 0 : i32
    %c0_i32_0 = arith.constant 0 : i32
    %c0_i32_1 = arith.constant 0 : i32
    return %c0_i32, %c0_i32_0 : i32, i32
  }
  func.func @transform_5(%arg0: i32, %arg1: i32) -> (i32, i32) {
    %c0_i32 = arith.constant 0 : i32
    %c0_i32_0 = arith.constant 0 : i32
    %c0_i32_1 = arith.constant 0 : i32
    return %c0_i32, %c0_i32_0 : i32, i32
  }
  func.func @transform_6(%arg0: i32, %arg1: i32) -> (i32, i32) {
    %c0_i32 = arith.constant 0 : i32
    %c0_i32_0 = arith.constant 0 : i32
    %c0_i32_1 = arith.constant 0 : i32
    return %c0_i32, %c0_i32_0 : i32, i32
  }
  func.func @transform_7(%arg0: i32, %arg1: i32) -> (i32, i32) {
    %c0_i32 = arith.constant 0 : i32
    %c0_i32_0 = arith.constant 0 : i32
    %c0_i32_1 = arith.constant 0 : i32
    return %c0_i32, %c0_i32_0 : i32, i32
  }
  func.func @transform_8(%arg0: i32, %arg1: i32) -> (i32, i32) {
    %c0_i32 = arith.constant 0 : i32
    %c0_i32_0 = arith.constant 0 : i32
    %c0_i32_1 = arith.constant 0 : i32
    return %c0_i32, %c0_i32_0 : i32, i32
  }
  func.func @transform_9(%arg0: i32, %arg1: i32) -> (i32, i32) {
    %c0_i32 = arith.constant 0 : i32
    %c0_i32_0 = arith.constant 0 : i32
    %c0_i32_1 = arith.constant 0 : i32
    return %c0_i32, %c0_i32_0 : i32, i32
  }
  func.func @transform_10(%arg0: i32, %arg1: i32) -> (i32, i32) {
    %c0_i32 = arith.constant 0 : i32
    %c0_i32_0 = arith.constant 0 : i32
    %c0_i32_1 = arith.constant 0 : i32
    return %c0_i32, %c0_i32_0 : i32, i32
  }
  func.func @transform_11(%arg0: i32, %arg1: i32) -> (i32, i32) {
    %c0_i32 = arith.constant 0 : i32
    %c0_i32_0 = arith.constant 0 : i32
    %c0_i32_1 = arith.constant 0 : i32
    return %c0_i32, %c0_i32_0 : i32, i32
  }
  func.func @transform_12(%arg0: i32, %arg1: i32) -> (i32, i32, i32) {
    %c0_i32 = arith.constant 0 : i32
    %c0_i32_0 = arith.constant 0 : i32
    return %arg0, %arg1, %c0_i32 : i32, i32, i32
  }
}

module attributes {stable_mosaic.version = 11 : i64} {
  func.func @_post_kernel(%arg0: i32, %arg1: i32, %arg2: memref<1x8x32xf32, #tpu.memory_space<vmem>>, %arg3: memref<1x8x32xbf16, #tpu.memory_space<vmem>>, %arg4: memref<32x32xbf16, #tpu.memory_space<vmem>>, %arg5: memref<1x32xf32, #tpu.memory_space<vmem>>, %arg6: memref<1x32xf32, #tpu.memory_space<vmem>>, %arg7: memref<1x32xf32, #tpu.memory_space<vmem>>, %arg8: memref<32x64xbf16, #tpu.memory_space<vmem>>, %arg9: memref<1x64xf32, #tpu.memory_space<vmem>>, %arg10: memref<64x32xbf16, #tpu.memory_space<vmem>>, %arg11: memref<1x32xf32, #tpu.memory_space<vmem>>, %arg12: memref<1x32xf32, #tpu.memory_space<vmem>>, %arg13: memref<1x32xf32, #tpu.memory_space<vmem>>, %arg14: memref<1x8x32xf32, #tpu.memory_space<vmem>>) attributes {dimension_semantics = [#tpu.dimension_semantics<parallel>, #tpu.dimension_semantics<parallel>], iteration_bounds = array<i64: 2, 1>, scalar_prefetch = 0 : i64, scratch_operands = 0 : i64, tpu.core_type = #tpu.core_type<tc>, window_params = [{transform_indices = @transform_0, window_bounds = array<i64: 1, 8, 32>}, {transform_indices = @transform_1, window_bounds = array<i64: 1, 8, 32>}, {pipeline_mode = #tpu.pipeline_mode<synchronous>, transform_indices = @transform_2, window_bounds = array<i64: 32, 32>}, {pipeline_mode = #tpu.pipeline_mode<synchronous>, transform_indices = @transform_3, window_bounds = array<i64: 1, 32>}, {pipeline_mode = #tpu.pipeline_mode<synchronous>, transform_indices = @transform_4, window_bounds = array<i64: 1, 32>}, {pipeline_mode = #tpu.pipeline_mode<synchronous>, transform_indices = @transform_5, window_bounds = array<i64: 1, 32>}, {pipeline_mode = #tpu.pipeline_mode<synchronous>, transform_indices = @transform_6, window_bounds = array<i64: 32, 64>}, {pipeline_mode = #tpu.pipeline_mode<synchronous>, transform_indices = @transform_7, window_bounds = array<i64: 1, 64>}, {pipeline_mode = #tpu.pipeline_mode<synchronous>, transform_indices = @transform_8, window_bounds = array<i64: 64, 32>}, {pipeline_mode = #tpu.pipeline_mode<synchronous>, transform_indices = @transform_9, window_bounds = array<i64: 1, 32>}, {pipeline_mode = #tpu.pipeline_mode<synchronous>, transform_indices = @transform_10, window_bounds = array<i64: 1, 32>}, {pipeline_mode = #tpu.pipeline_mode<synchronous>, transform_indices = @transform_11, window_bounds = array<i64: 1, 32>}, {transform_indices = @transform_12, window_bounds = array<i64: 1, 8, 32>}]} {
    %c0 = arith.constant 0 : index
    %c0_0 = arith.constant 0 : index
    %c0_1 = arith.constant 0 : index
    %0 = vector.load %arg2[%c0, %c0_0, %c0_1] : memref<1x8x32xf32, #tpu.memory_space<vmem>>, vector<1x8x32xf32>
    %1 = vector.shape_cast %0 : vector<1x8x32xf32> to vector<8x32xf32>
    %c0_2 = arith.constant 0 : index
    %c0_3 = arith.constant 0 : index
    %c0_4 = arith.constant 0 : index
    %2 = vector.load %arg3[%c0_2, %c0_3, %c0_4] : memref<1x8x32xbf16, #tpu.memory_space<vmem>>, vector<1x8x32xbf16>
    %3 = vector.shape_cast %2 : vector<1x8x32xbf16> to vector<8x32xbf16>
    %c0_5 = arith.constant 0 : index
    %c0_6 = arith.constant 0 : index
    %4 = vector.load %arg4[%c0_5, %c0_6] : memref<32x32xbf16, #tpu.memory_space<vmem>>, vector<32x32xbf16>
    %cst = arith.constant dense<0.000000e+00> : vector<8x32xf32>
    %5 = tpu.matmul %3, %4, %cst {dimension_numbers = #tpu.dot_dimension_numbers<[1], [0], [0], [1], [0, 0, 1, 1], [], []>} : vector<8x32xbf16>, vector<32x32xbf16>, vector<8x32xf32> -> vector<8x32xf32>
    %c0_7 = arith.constant 0 : index
    %c0_8 = arith.constant 0 : index
    %6 = vector.load %arg5[%c0_7, %c0_8] : memref<1x32xf32, #tpu.memory_space<vmem>>, vector<1x32xf32>
    %7 = vector.broadcast %6 : vector<1x32xf32> to vector<8x32xf32>
    %8 = arith.addf %5, %7 : vector<8x32xf32>
    %9 = arith.addf %1, %8 : vector<8x32xf32>
    %c0_9 = arith.constant 0 : index
    %c0_10 = arith.constant 0 : index
    %10 = vector.load %arg6[%c0_9, %c0_10] : memref<1x32xf32, #tpu.memory_space<vmem>>, vector<1x32xf32>
    %c0_11 = arith.constant 0 : index
    %c0_12 = arith.constant 0 : index
    %11 = vector.load %arg7[%c0_11, %c0_12] : memref<1x32xf32, #tpu.memory_space<vmem>>, vector<1x32xf32>
    %cst_13 = arith.constant dense<0.000000e+00> : vector<8xf32>
    %12 = vector.multi_reduction <add>, %9, %cst_13 [1] : vector<8x32xf32> to vector<8xf32>
    %13 = vector.shape_cast %12 : vector<8xf32> to vector<8x1xf32>
    %cst_14 = arith.constant 3.200000e+01 : f32
    %14 = vector.broadcast %cst_14 : f32 to vector<8x1xf32>
    %15 = arith.divf %13, %14 : vector<8x1xf32>
    %16 = vector.broadcast %15 : vector<8x1xf32> to vector<8x32xf32>
    %17 = arith.subf %9, %16 : vector<8x32xf32>
    %18 = arith.mulf %17, %17 : vector<8x32xf32>
    %cst_15 = arith.constant dense<0.000000e+00> : vector<8xf32>
    %19 = vector.multi_reduction <add>, %18, %cst_15 [1] : vector<8x32xf32> to vector<8xf32>
    %20 = vector.shape_cast %19 : vector<8xf32> to vector<8x1xf32>
    %cst_16 = arith.constant 3.200000e+01 : f32
    %21 = vector.broadcast %cst_16 : f32 to vector<8x1xf32>
    %22 = arith.divf %20, %21 : vector<8x1xf32>
    %23 = vector.broadcast %15 : vector<8x1xf32> to vector<8x32xf32>
    %24 = arith.subf %9, %23 : vector<8x32xf32>
    %cst_17 = arith.constant 9.99999996E-13 : f32
    %25 = vector.broadcast %cst_17 : f32 to vector<8x1xf32>
    %26 = arith.addf %22, %25 : vector<8x1xf32>
    %27 = math.rsqrt %26 : vector<8x1xf32>
    %28 = vector.broadcast %27 : vector<8x1xf32> to vector<8x32xf32>
    %29 = arith.mulf %24, %28 : vector<8x32xf32>
    %30 = vector.broadcast %10 : vector<1x32xf32> to vector<8x32xf32>
    %31 = arith.mulf %30, %29 : vector<8x32xf32>
    %32 = vector.broadcast %11 : vector<1x32xf32> to vector<8x32xf32>
    %33 = arith.addf %31, %32 : vector<8x32xf32>
    %34 = arith.truncf %33 : vector<8x32xf32> to vector<8x32xbf16>
    %c0_18 = arith.constant 0 : index
    %c0_19 = arith.constant 0 : index
    %35 = vector.load %arg8[%c0_18, %c0_19] : memref<32x64xbf16, #tpu.memory_space<vmem>>, vector<32x64xbf16>
    %cst_20 = arith.constant dense<0.000000e+00> : vector<8x64xf32>
    %36 = tpu.matmul %34, %35, %cst_20 {dimension_numbers = #tpu.dot_dimension_numbers<[1], [0], [0], [1], [0, 0, 1, 1], [], []>} : vector<8x32xbf16>, vector<32x64xbf16>, vector<8x64xf32> -> vector<8x64xf32>
    %c0_21 = arith.constant 0 : index
    %c0_22 = arith.constant 0 : index
    %37 = vector.load %arg9[%c0_21, %c0_22] : memref<1x64xf32, #tpu.memory_space<vmem>>, vector<1x64xf32>
    %38 = vector.broadcast %37 : vector<1x64xf32> to vector<8x64xf32>
    %39 = arith.addf %36, %38 : vector<8x64xf32>
    %cst_23 = arith.constant 5.000000e-01 : f32
    %40 = vector.broadcast %cst_23 : f32 to vector<8x64xf32>
    %41 = arith.mulf %40, %39 : vector<8x64xf32>
    %cst_24 = arith.constant 0.707106769 : f32
    %42 = vector.broadcast %cst_24 : f32 to vector<8x64xf32>
    %43 = arith.mulf %39, %42 : vector<8x64xf32>
    %44 = math.absf %43 : vector<8x64xf32>
    %cst_25 = arith.constant 0.327591091 : f32
    %45 = vector.broadcast %cst_25 : f32 to vector<8x64xf32>
    %46 = arith.mulf %45, %44 : vector<8x64xf32>
    %cst_26 = arith.constant 1.000000e+00 : f32
    %47 = vector.broadcast %cst_26 : f32 to vector<8x64xf32>
    %48 = arith.addf %47, %46 : vector<8x64xf32>
    %cst_27 = arith.constant 1.000000e+00 : f32
    %49 = vector.broadcast %cst_27 : f32 to vector<8x64xf32>
    %50 = arith.divf %49, %48 : vector<8x64xf32>
    %cst_28 = arith.constant 1.06140542 : f32
    %51 = vector.broadcast %cst_28 : f32 to vector<8x64xf32>
    %52 = arith.mulf %51, %50 : vector<8x64xf32>
    %cst_29 = arith.constant -1.45315206 : f32
    %53 = vector.broadcast %cst_29 : f32 to vector<8x64xf32>
    %54 = arith.addf %52, %53 : vector<8x64xf32>
    %55 = arith.mulf %54, %50 : vector<8x64xf32>
    %cst_30 = arith.constant 1.42141378 : f32
    %56 = vector.broadcast %cst_30 : f32 to vector<8x64xf32>
    %57 = arith.addf %55, %56 : vector<8x64xf32>
    %58 = arith.mulf %57, %50 : vector<8x64xf32>
    %cst_31 = arith.constant -0.284496725 : f32
    %59 = vector.broadcast %cst_31 : f32 to vector<8x64xf32>
    %60 = arith.addf %58, %59 : vector<8x64xf32>
    %61 = arith.mulf %60, %50 : vector<8x64xf32>
    %cst_32 = arith.constant 0.254829586 : f32
    %62 = vector.broadcast %cst_32 : f32 to vector<8x64xf32>
    %63 = arith.addf %61, %62 : vector<8x64xf32>
    %64 = arith.mulf %63, %50 : vector<8x64xf32>
    %cst_33 = arith.constant 0.000000e+00 : f32
    %65 = vector.broadcast %cst_33 : f32 to vector<8x64xf32>
    %66 = arith.subf %65, %44 : vector<8x64xf32>
    %67 = arith.mulf %66, %44 : vector<8x64xf32>
    %68 = math.exp %67 : vector<8x64xf32>
    %69 = arith.mulf %64, %68 : vector<8x64xf32>
    %cst_34 = arith.constant 1.000000e+00 : f32
    %70 = vector.broadcast %cst_34 : f32 to vector<8x64xf32>
    %71 = arith.subf %70, %69 : vector<8x64xf32>
    %cst_35 = arith.constant 0.000000e+00 : f32
    %72 = vector.broadcast %cst_35 : f32 to vector<8x64xf32>
    %73 = arith.cmpf oge, %43, %72 : vector<8x64xf32>
    %cst_36 = arith.constant 0.000000e+00 : f32
    %74 = vector.broadcast %cst_36 : f32 to vector<8x64xf32>
    %75 = arith.subf %74, %71 : vector<8x64xf32>
    %76 = arith.select %73, %71, %75 : vector<8x64xi1>, vector<8x64xf32>
    %cst_37 = arith.constant 1.000000e+00 : f32
    %77 = vector.broadcast %cst_37 : f32 to vector<8x64xf32>
    %78 = arith.addf %77, %76 : vector<8x64xf32>
    %79 = arith.mulf %41, %78 : vector<8x64xf32>
    %80 = arith.truncf %79 : vector<8x64xf32> to vector<8x64xbf16>
    %c0_38 = arith.constant 0 : index
    %c0_39 = arith.constant 0 : index
    %81 = vector.load %arg10[%c0_38, %c0_39] : memref<64x32xbf16, #tpu.memory_space<vmem>>, vector<64x32xbf16>
    %cst_40 = arith.constant dense<0.000000e+00> : vector<8x32xf32>
    %82 = tpu.matmul %80, %81, %cst_40 {dimension_numbers = #tpu.dot_dimension_numbers<[1], [0], [0], [1], [0, 0, 1, 1], [], []>} : vector<8x64xbf16>, vector<64x32xbf16>, vector<8x32xf32> -> vector<8x32xf32>
    %c0_41 = arith.constant 0 : index
    %c0_42 = arith.constant 0 : index
    %83 = vector.load %arg11[%c0_41, %c0_42] : memref<1x32xf32, #tpu.memory_space<vmem>>, vector<1x32xf32>
    %84 = vector.broadcast %83 : vector<1x32xf32> to vector<8x32xf32>
    %85 = arith.addf %82, %84 : vector<8x32xf32>
    %86 = arith.addf %33, %85 : vector<8x32xf32>
    %c0_43 = arith.constant 0 : index
    %c0_44 = arith.constant 0 : index
    %87 = vector.load %arg12[%c0_43, %c0_44] : memref<1x32xf32, #tpu.memory_space<vmem>>, vector<1x32xf32>
    %c0_45 = arith.constant 0 : index
    %c0_46 = arith.constant 0 : index
    %88 = vector.load %arg13[%c0_45, %c0_46] : memref<1x32xf32, #tpu.memory_space<vmem>>, vector<1x32xf32>
    %cst_47 = arith.constant dense<0.000000e+00> : vector<8xf32>
    %89 = vector.multi_reduction <add>, %86, %cst_47 [1] : vector<8x32xf32> to vector<8xf32>
    %90 = vector.shape_cast %89 : vector<8xf32> to vector<8x1xf32>
    %cst_48 = arith.constant 3.200000e+01 : f32
    %91 = vector.broadcast %cst_48 : f32 to vector<8x1xf32>
    %92 = arith.divf %90, %91 : vector<8x1xf32>
    %93 = vector.broadcast %92 : vector<8x1xf32> to vector<8x32xf32>
    %94 = arith.subf %86, %93 : vector<8x32xf32>
    %95 = arith.mulf %94, %94 : vector<8x32xf32>
    %cst_49 = arith.constant dense<0.000000e+00> : vector<8xf32>
    %96 = vector.multi_reduction <add>, %95, %cst_49 [1] : vector<8x32xf32> to vector<8xf32>
    %97 = vector.shape_cast %96 : vector<8xf32> to vector<8x1xf32>
    %cst_50 = arith.constant 3.200000e+01 : f32
    %98 = vector.broadcast %cst_50 : f32 to vector<8x1xf32>
    %99 = arith.divf %97, %98 : vector<8x1xf32>
    %100 = vector.broadcast %92 : vector<8x1xf32> to vector<8x32xf32>
    %101 = arith.subf %86, %100 : vector<8x32xf32>
    %cst_51 = arith.constant 9.99999996E-13 : f32
    %102 = vector.broadcast %cst_51 : f32 to vector<8x1xf32>
    %103 = arith.addf %99, %102 : vector<8x1xf32>
    %104 = math.rsqrt %103 : vector<8x1xf32>
    %105 = vector.broadcast %104 : vector<8x1xf32> to vector<8x32xf32>
    %106 = arith.mulf %101, %105 : vector<8x32xf32>
    %107 = vector.broadcast %87 : vector<1x32xf32> to vector<8x32xf32>
    %108 = arith.mulf %107, %106 : vector<8x32xf32>
    %109 = vector.broadcast %88 : vector<1x32xf32> to vector<8x32xf32>
    %110 = arith.addf %108, %109 : vector<8x32xf32>
    %c0_52 = arith.constant 0 : index
    %c0_53 = arith.constant 0 : index
    %c0_54 = arith.constant 0 : index
    %111 = vector.load %arg14[%c0_52, %c0_53, %c0_54] : memref<1x8x32xf32, #tpu.memory_space<vmem>>, vector<1x8x32xf32>
    %112 = vector.shape_cast %111 : vector<1x8x32xf32> to vector<8x32xf32>
    %113 = vector.shape_cast %110 : vector<8x32xf32> to vector<1x8x32xf32>
    tpu.vector_store %arg14[%c0_52, %c0_53, %c0_54], %113 {strides = array<i32>} : memref<1x8x32xf32, #tpu.memory_space<vmem>>, vector<1x8x32xf32>,
    return
  }
  func.func @transform_0(%arg0: i32, %arg1: i32) -> (i32, i32, i32) {
    %c0_i32 = arith.constant 0 : i32
    %c0_i32_0 = arith.constant 0 : i32
    return %arg0, %arg1, %c0_i32 : i32, i32, i32
  }
  func.func @transform_1(%arg0: i32, %arg1: i32) -> (i32, i32, i32) {
    %c0_i32 = arith.constant 0 : i32
    %c0_i32_0 = arith.constant 0 : i32
    return %arg0, %arg1, %c0_i32 : i32, i32, i32
  }
  func.func @transform_2(%arg0: i32, %arg1: i32) -> (i32, i32) {
    %c0_i32 = arith.constant 0 : i32
    %c0_i32_0 = arith.constant 0 : i32
    %c0_i32_1 = arith.constant 0 : i32
    return %c0_i32, %c0_i32_0 : i32, i32
  }
  func.func @transform_3(%arg0: i32, %arg1: i32) -> (i32, i32) {
    %c0_i32 = arith.constant 0 : i32
    %c0_i32_0 = arith.constant 0 : i32
    %c0_i32_1 = arith.constant 0 : i32
    return %c0_i32, %c0_i32_0 : i32, i32
  }
  func.func @transform_4(%arg0: i32, %arg1: i32) -> (i32, i32) {
    %c0_i32 = arith.constant 0 : i32
    %c0_i32_0 = arith.constant 0 : i32
    %c0_i32_1 = arith.constant 0 : i32
    return %c0_i32, %c0_i32_0 : i32, i32
  }
  func.func @transform_5(%arg0: i32, %arg1: i32) -> (i32, i32) {
    %c0_i32 = arith.constant 0 : i32
    %c0_i32_0 = arith.constant 0 : i32
    %c0_i32_1 = arith.constant 0 : i32
    return %c0_i32, %c0_i32_0 : i32, i32
  }
  func.func @transform_6(%arg0: i32, %arg1: i32) -> (i32, i32) {
    %c0_i32 = arith.constant 0 : i32
    %c0_i32_0 = arith.constant 0 : i32
    %c0_i32_1 = arith.constant 0 : i32
    return %c0_i32, %c0_i32_0 : i32, i32
  }
  func.func @transform_7(%arg0: i32, %arg1: i32) -> (i32, i32) {
    %c0_i32 = arith.constant 0 : i32
    %c0_i32_0 = arith.constant 0 : i32
    %c0_i32_1 = arith.constant 0 : i32
    return %c0_i32, %c0_i32_0 : i32, i32
  }
  func.func @transform_8(%arg0: i32, %arg1: i32) -> (i32, i32) {
    %c0_i32 = arith.constant 0 : i32
    %c0_i32_0 = arith.constant 0 : i32
    %c0_i32_1 = arith.constant 0 : i32
    return %c0_i32, %c0_i32_0 : i32, i32
  }
  func.func @transform_9(%arg0: i32, %arg1: i32) -> (i32, i32) {
    %c0_i32 = arith.constant 0 : i32
    %c0_i32_0 = arith.constant 0 : i32
    %c0_i32_1 = arith.constant 0 : i32
    return %c0_i32, %c0_i32_0 : i32, i32
  }
  func.func @transform_10(%arg0: i32, %arg1: i32) -> (i32, i32) {
    %c0_i32 = arith.constant 0 : i32
    %c0_i32_0 = arith.constant 0 : i32
    %c0_i32_1 = arith.constant 0 : i32
    return %c0_i32, %c0_i32_0 : i32, i32
  }
  func.func @transform_11(%arg0: i32, %arg1: i32) -> (i32, i32) {
    %c0_i32 = arith.constant 0 : i32
    %c0_i32_0 = arith.constant 0 : i32
    %c0_i32_1 = arith.constant 0 : i32
    return %c0_i32, %c0_i32_0 : i32, i32
  }
  func.func @transform_12(%arg0: i32, %arg1: i32) -> (i32, i32, i32) {
    %c0_i32 = arith.constant 0 : i32
    %c0_i32_0 = arith.constant 0 : i32
    return %arg0, %arg1, %c0_i32 : i32, i32, i32
  }
}

</mosaic_0001>

<bundles_post_ra>
// kernel: tpu_custom_call.1
= control target key start
LH: loop header
LB: loop body
LE: loop exit
PB: predicated region body
PF: predicated region fallthrough
CT: control target
= control target key end

     0   :  { %6 = vsyncpa [#allocation3], 0  ;;  %s482_s0 = inlined_call_operand.hbm [shape: f32[8,128], index: 0, kind: input, shape index: {}]   ;;  %s483_s1 = inlined_call_operand.hbm [shape: f32[16,128], index: 1, kind: output, shape index: {}]  }
   0x1   :  { %7 = vsyncpa [#allocation4], 0 }
   0x2   :  { %9 = vsyncpa [#allocation4 + $0x1], 0  ;;  %s352_s6 = smov 0   ;;  %s354_s7 = smov 0  }
   0x3   :  { %s356_s8 = smov 0   ;;  %s358_s9 = smov 0  }
   0x4 LB: > { %s373_s10 = sadd.s32 4294967295, %s338_s9   ;;  %s184_s11 = sadd.s32 4294967294, %s338_s9   ;;  %s338_s9 = sphi %s358_s9, %s499_s9   ;;  %s334_s8 = sphi %s356_s8, %s498_s8   ;;  %s330_s7 = sphi %s354_s7, %s497_s7   ;;  %s326_s6 = sphi %s352_s6, %s496_s6  }
   0x5   : > { %s377_s12 = sadd.s32 1, %s338_s9   ;;  %s43_s13 = sadd.s32 1, %s334_s8 }
   0x6   : > { %s40_s14 = ssub.s32 %s338_s9, %s377_s12  ;;  %p53_p0 = scmp.ne.s32.totalorder %s334_s8, %s330_s7 }
   0x7   : > { %p41_p1 = scmp.eq.s32.totalorder %s40_s14, 0  ;;  %p54_p2 = scmp.eq.s32.totalorder %s373_s10, 1 }
   0x8   : > { %p59_p3 = scmp.ne.s32.totalorder %s330_s7, %s326_s6  ;;  %p60_p4 = scmp.eq.s32.totalorder %s184_s11, 1 }
   0x9   : > { %s388_s15 = scalar_select %p41_p1, %s334_s8, %s43_s13  }
   0xa   : > { %p390_p5 = por %p54_p2, %p53_p0  ;;  %p394_p6 = por %p60_p4, %p59_p3 }
   0xb   : > { %p185_p7 = scmp.ge.s32.totalorder %s338_s9, 1  ;;  %p67_p8 = scmp.lt.s32.totalorder %s338_s9, 3 }
   0xc   : > { %s487_s16 = scalar_select %p390_p5, 1, 0 }
   0xd   : > { %s488_s17 = scalar_select %p394_p6, 1, 0 }
   0xe   : > { %p484_p9 = scmp.eq.s32.totalorder %s373_s10, 0  ;;  %p401_p10 = pnand %p185_p7, %p67_p8 }
   0xf   : > { %s340_s19 = smov [#allocation2]   ;;  %s244_s24 = scalar_lea.hbm %s482_s0, 128 }
  0x10   : > { %s489_s18 = scalar_select %p401_p10, 1, 0 }
  0x11   : > { %s80_s20 = sshll.u32 %s340_s19, 4  ;;  %p200_p11 = pneg %p401_p10  ;;  %s81_s20 = int_to_ptr.vmem [resolvable:$true] %s80_s20 }
  0x12   : > { %p245_p13 = scmp.ne.s32.totalorder %s482_s0, %s244_s24  ;;  %p251_p3 = scmp.lt.u32.totalorder %s244_s24, %s482_s0 }
  0x13   : > { %p409_p12 = pnand %p484_p9, %p200_p11 }
  0x15   : > { %p246_p0 = pneg %p409_p12 }
  0x17   : > { %p247_p1 = pnand %p246_p0, %p245_p13 }
  0x19   : > { %p248_p2 = pneg %p247_p1 }
  0x1b   : > { %p253_p4 = pnand %p251_p3, %p248_p2 }
  0x1d   : > { %256 = shalt.err (!%p253_p4)
}
  0x1e   : > { %s257_s29 = scalar_lea.vmem %s81_s20, 128  ;;  %p265_p9 = scmp.lt.s32.totalorder %s81_s20, %s81_s20 }
  0x1f   : > { %p258_p7 = scmp.ne.s32.totalorder %s81_s20, %s257_s29  ;;  %p266_p6 = scmp.lt.s32.totalorder %s257_s29, %s257_s29 }
  0x21   : > { %p260_p8 = pnand %p258_p7, %p246_p0  ;;  %p267_p5 = por %p266_p6, %p265_p9 }
  0x23   : > { %p261_p11 = pneg %p260_p8 }
  0x25   : > { %p268_p10 = pnand %p267_p5, %p261_p11 }
  0x27   : > { %271 = shalt.err (!%p268_p10)
}
  0x28   : > { %203 = dma.hbm_to_vmem [thread:$0]  (!%p409_p12), %s482_s0, 128, %s81_s20, [#allocation3]  }
  0x29   : > { %p491_p13 = scmp.ne.s32.totalorder %s489_s18, 0 }
  0x2a   : > { %p492_p1 = scmp.eq.s32.totalorder (!%p491_p13), %s373_s10, 0 }
  0x2b   : > { %93 = sbr.rel (%p491_p13) target bundleno = 77 (0x4d), region = 24 }
  0x32   : > { %317 = dma.done.wait (%p492_p1), [#allocation3], 128   ;;  %p493_p0 = pmov %p492_p1 }
  0x33   : > { %s105_s3 = sand.u32 1, %s330_s7   ;;  %s191_s13 = sshll.u32 %s373_s10, 7  ;;  %v108_v0 = vld [vmem:[#allocation2] sm:$0xff] }
  0x34   : > { %319 = vsyncadd (%p493_p0), [#allocation3], 4294967168  ;;  %s189_s4 = sshll.u32 %s105_s3, 3  ;;  %v109_v1 = vadd.f32 1.0, %v108_v0  ;;  %s442_s19 = scalar_lea.hbm %s483_s1, %s191_s13 }
  0x35   : > { %s107_s5 = scalar_lea.vmem [#allocation5], %s189_s4  ;;  %s112_s20 = scalar_lea.sflag [#allocation4], %s105_s3 }
  0x36   : > { %s125_s11 = sshll.u32 %s107_s5, 4  ;;  %110 = vst [vmem:[%s107_s5] sm:$0xff] %v109_v1  ;;  %p494_p6 = scmp.ne.s32.totalorder %s487_s16, 0  ;;  %s437_s11 = int_to_ptr.vmem [resolvable:$true] %s125_s11 }
  0x37   : > { %s272_s21 = scalar_lea.vmem %s437_s11, 128  ;;  %s341_s10 = smov [#allocation5]  }
  0x38   : > { %p273_p5 = scmp.ne.s32.totalorder %s437_s11, %s272_s21  ;;  %s276_s22 = sshll.u32 %s341_s10, 4  ;;  %s277_s22 = int_to_ptr.vmem [resolvable:$false] %s276_s22 }
  0x39   : > { %s278_s23 = scalar_lea.vmem %s277_s22, 256  ;;  %p279_p12 = scmp.lt.s32.totalorder %s437_s11, %s277_s22 }
  0x3a   : > { %p274_p9 = pnand %p273_p5, %p494_p6  ;;  %p280_p2 = scmp.lt.s32.totalorder %s278_s23, %s272_s21 }
  0x3c   : > { %p275_p10 = pneg %p274_p9  ;;  %p281_p3 = por %p280_p2, %p279_p12 }
  0x3e   : > { %p282_p4 = pnand %p281_p3, %p275_p10 }
  0x40   : > { %285 = shalt.err (!%p282_p4)
}
  0x41   : > { %s286_s24 = scalar_lea.hbm %s442_s19, 128  ;;  %s290_s27 = scalar_lea.hbm %s483_s1, 256 }
  0x42   : > { %p287_p7 = scmp.ne.s32.totalorder %s442_s19, %s286_s24  ;;  %p291_p13 = scmp.lt.u32.totalorder %s442_s19, %s483_s1 }
  0x43   : > { %p292_p1 = scmp.lt.u32.totalorder %s290_s27, %s286_s24  ;;  %p294_p5 = scmp.lt.u32.totalorder %s286_s24, %s442_s19 }
  0x44   : > { %p288_p8 = pnand %p287_p7, %p494_p6 }
  0x45   : > { %p293_p0 = por %p292_p1, %p291_p13 }
  0x46   : > { %p289_p11 = pneg %p288_p8 }
  0x47   : > { %p295_p9 = por %p294_p5, %p293_p0 }
  0x49   : > { %p296_p10 = pnand %p295_p9, %p289_p11 }
  0x4b   : > { %299 = shalt.err (!%p296_p10)
}
  0x4c   : > { %198 = dma.vmem_to_hbm [thread:$0]  (%p494_p6), %s437_s11, 128, %s442_s19, %s112_s20  }
  0x4d PF: > { %p210_p12 = scmp.ge.s32.totalorder %s338_s9, 2  ;;  %s137_s30 = sand.u32 1, %s326_s6  }
  0x4e   : > { %p495_p2 = scmp.ne.s32.totalorder %s488_s17, 0  ;;  %s138_s2 = scalar_lea.sflag [#allocation4], %s137_s30 }
  0x50   : > { %p205_p3 = pnand %p210_p12, %p495_p2 }
  0x52   : > { %321 = dma.done.wait (!%p205_p3), %s138_s2, 128  }
  0x53   : > { %323 = vsyncadd (!%p205_p3), %s138_s2, 4294967168  ;;  %p12_p4 = scmp.ge.s32.totalorder %s377_s12, 4   ;;  %s496_s6 = smov %s330_s7 }
  0x54   : > { %s497_s7 = smov %s334_s8  ;;  %s498_s8 = smov %s388_s15 }
  0x55   : > { %s499_s9 = smov %s377_s12  ;;  %14 = sbr.rel (!%p12_p4) target bundleno = 4 (0x4), region = 61 }
  0x5c   :  { %143 = vsyncpa [#allocation3], 1 }
  0x5d   :  { %145 = vsyncpa [#allocation3 + $0x1], 1 }
  0x5e   :  { %146 = vsyncpa [#allocation4], 1 }
  0x5f   :  { %148 = vsyncpa [#allocation4 + $0x1], 1 }

// kernel: _forward_impl.8
= control target key start
LH: loop header
LB: loop body
LE: loop exit
PB: predicated region body
PF: predicated region fallthrough
CT: control target
= control target key end

     0   :  { %s735_s18 = smov 0   ;;  %s737_s19 = smov 0   ;;  %s800_s0 = inlined_call_operand.vmem [shape: f32[2,8,32], index: 0, kind: input, shape index: {}]   ;;  %s801_s1 = inlined_call_operand.vmem [shape: bf16[32,96], index: 1, kind: input, shape index: {}]   ;;  %s802_s2 = inlined_call_operand.vmem [shape: f32[1,96], index: 2, kind: input, shape index: {}]   ;;  %s803_s3 = inlined_call_operand.vmem [shape: bf16[2,4,8,8], index: 3, kind: output, shape index: {0}]   ;;  %s804_s4 = inlined_call_operand.vmem [shape: bf16[2,4,8,8], index: 4, kind: output, shape index: {1}]   ;;  %s805_s5 = inlined_call_operand.vmem [shape: bf16[2,4,8,8], index: 5, kind: output, shape index: {2}]  }
   0x1   :  { %s739_s20 = smov 0  }
   0x2 LB: > { %s28_s21 = sadd.s32 1, %s692_s19  ;;  %p605_p0 = scmp.ge.s32.totalorder %s696_s20, 1  ;;  %s696_s20 = sphi %s739_s20, %s16_s20   ;;  %s692_s19 = sphi %s737_s19, %s807_s19   ;;  %s688_s18 = sphi %s735_s18, %s806_s18  }
   0x3   : > { %p30_p1 = scmp.ge.s32.totalorder %s28_s21, 2  ;;  %p214_p2 = scmp.lt.s32.totalorder %s696_s20, 3 }
   0x5   : > { %s809_s21 = smov (%p30_p1, %s28_s21), 0  ;;  %p215_p3 = pnand %p605_p0, %p214_p2 }
   0x6   : > { %v672_v0 = vld [vmem:[%s801_s1] sm:$0xff] (!%p215_p3)   ;;  %v698_v1 = vmov (!%p215_p3), 0.0   ;;  %v673_v2 = vld [vmem:[%s801_s1 + $0x8] sm:$0xff] (!%p215_p3)   ;;  %vm699_vm0 = vmmov (!%p215_p3), 0   ;;  %p263_p4 = scmp.lt.s32.totalorder (!%p215_p3), %s688_s18, 1  ;;  %vm320_vm1 = vcmask (!%p215_p3), 261120  }
   0x7   : > { %218 = sbr.rel (%p215_p3) target bundleno = 479 (0x1df), region = 32  ;;  %633 = vmatprep.subr.bf16.mxu0 (!%p215_p3), %v698_v1  ;;  %637 = vmatprep.mubr.msk.bf16.mxu0 (!%p215_p3), %vm699_vm0, %v698_v1  ;;  %v613_v5 = vld [vmem:[%s802_s2] ss:$0 sm:$0xff] (!%p215_p3)  ;;  %vm378_vm2 = vcmask (!%p215_p3), 60416   ;;  %s700_s11 = smov (!%p215_p3), 104  }
   0x8   : > { %634 = vmatpush3.bf16.msra.mxu0 (!%p215_p3), %v672_v0  ;;  %s701_s12 = smov (!%p215_p3), 120   ;;  %s702_s13 = smov (!%p215_p3), 112  }
   0x9   : > { %635 = vmatprep.subr.bf16.mxu0 (!%p215_p3), %v698_v1  ;;  %s703_s14 = smov (!%p215_p3), 96   ;;  %s704_s15 = smov (!%p215_p3), 64  }
   0xc   : > { %636 = vmatpush3.bf16.msra.mxu0 (!%p215_p3), %v673_v2 }
   0xe   : > { %s811_s18 = smov (!%p263_p4, %s688_s18), 1 }
   0xf   : > { %s606_s26 = sshll.u32 %s811_s18, 3  ;;  %s765_s7 = sshll.u32 %s811_s18, 4 }
  0x10   : > { %s269_s29 = scalar_lea.vmem %s800_s0, %s606_s26  ;;  %s277_s10 = scalar_lea.vmem %s803_s3, %s765_s7 }
  0x11   : > { %v295_v3 = vld [vmem:[%s269_s29] sm:$0xff]  ;;  %s285_s18 = scalar_lea.vmem %s804_s4, %s765_s7  ;;  %s293_s24 = scalar_lea.vmem %s805_s5, %s765_s7 }
  0x12   : > { %v296_v4 = vpack.c.bf16 %v295_v3, %v295_v3 }
  0x14   : > { %638 = vmatmul.mubr.msk.bf16.vlgmr.msra.gmra.mrb[0].mxu0 %vm320_vm1, %v296_v4 }
  0xe7   : > { %v358_v6 = vpop.f32.mrb[0].mxu0 }
  0xe8   : > { %v359_v7 = vadd.f32 %v613_v5, %v358_v6  ;;  %v639_v8 = vpop.f32.mrb[1].mxu0 }
  0xe9   : > { %v361_v9 = vpop.f32.mrb[2].mxu0 }
  0xea   : > { %371 = vrot.lane.b32.xlu1 %v359_v7, %s700_s11  ;;  %365 = vrot.lane.b32.xlu0 %v359_v7, %s701_s12  ;;  %v640_v10 = vpop.f32.mrb[3].mxu0  ;;  %v374_v11 = vpack.c.bf16 %v359_v7, %v359_v7 }
  0xec   : > { %379 = vst.msk [vmem:[%s277_s10] sm:$0xf] %vm378_vm2, %v374_v11 }
  0xee   : > { %368 = vrot.lane.b32.xlu0 %v359_v7, %s702_s13  ;;  %395 = vrot.lane.b32.xlu1 %v374_v11, %s703_s14 }
  0xf2   : > { %411 = vrot.lane.b32.xlu1 %v374_v11, %s704_s15 }
 0x15c   : > { %v372_v12 = vpop.permute.xlu1 %371  ;;  %v366_v13 = vpop.permute.xlu0 %365 }
 0x15d   : > { %v377_v14 = vpack.c.bf16 %v372_v12, %v372_v12  ;;  %v375_v15 = vpack.c.bf16 %v366_v13, %v366_v13 }
 0x15f   : > { %382 = vst.msk [vmem:[%s277_s10 + $0xc] sm:$0xf] %vm378_vm2, %v377_v14  ;;  %380 = vst.msk [vmem:[%s277_s10 + $0x4] sm:$0xf] %vm378_vm2, %v375_v15  ;;  %397 = vrot.lane.b32.xlu0 %v375_v15, %s703_s14 }
 0x160   : > { %v369_v16 = vpop.permute.xlu0 %368  ;;  %v396_v17 = vpop.permute.xlu1 %395 }
 0x161   : > { %v376_v18 = vpack.c.bf16 %v369_v16, %v369_v16  ;;  %407 = vst.msk [vmem:[%s285_s18] sm:$0xf] %vm378_vm2, %v396_v17 }
 0x163   : > { %381 = vst.msk [vmem:[%s277_s10 + $0x8] sm:$0xf] %vm378_vm2, %v376_v18  ;;  %401 = vrot.lane.b32.xlu0 %v377_v14, %s703_s14  ;;  %399 = vrot.lane.b32.xlu1 %v376_v18, %s703_s14 }
 0x164   : > { %v412_v19 = vpop.permute.xlu1 %411 }
 0x165   : > { %423 = vst.msk [vmem:[%s293_s24] sm:$0xf] %vm378_vm2, %v412_v19 }
 0x167   : > { %413 = vrot.lane.b32.xlu0 %v375_v15, %s704_s15  ;;  %415 = vrot.lane.b32.xlu1 %v376_v18, %s704_s15 }
 0x16b   : > { %417 = vrot.lane.b32.xlu0 %v377_v14, %s704_s15 }
 0x1d1   : > { %v398_v20 = vpop.permute.xlu0 %397 }
 0x1d2   : > { %408 = vst.msk [vmem:[%s285_s18 + $0x4] sm:$0xf] %vm378_vm2, %v398_v20 }
 0x1d5   : > { %v402_v21 = vpop.permute.xlu0 %401  ;;  %v400_v22 = vpop.permute.xlu1 %399 }
 0x1d6   : > { %410 = vst.msk [vmem:[%s285_s18 + $0xc] sm:$0xf] %vm378_vm2, %v402_v21  ;;  %409 = vst.msk [vmem:[%s285_s18 + $0x8] sm:$0xf] %vm378_vm2, %v400_v22 }
 0x1d9   : > { %v414_v23 = vpop.permute.xlu0 %413  ;;  %v416_v24 = vpop.permute.xlu1 %415 }
 0x1da   : > { %424 = vst.msk [vmem:[%s293_s24 + $0x4] sm:$0xf] %vm378_vm2, %v414_v23  ;;  %425 = vst.msk [vmem:[%s293_s24 + $0x8] sm:$0xf] %vm378_vm2, %v416_v24 }
 0x1dd   : > { %v418_v25 = vpop.permute.xlu0 %417 }
 0x1de   : > { %426 = vst.msk [vmem:[%s293_s24 + $0xc] sm:$0xf] %vm378_vm2, %v418_v25 }
 0x1df PF: > { %s16_s20 = sadd.s32 1, %s696_s20   ;;  %s806_s18 = smov %s692_s19 }
 0x1e0   : > { %p13_p5 = scmp.ge.s32.totalorder %s16_s20, 4   ;;  %s807_s19 = smov %s809_s21 }
 0x1e2   :  { %15 = sbr.rel (!%p13_p5) target bundleno = 2 (0x2), region = 86 }

// kernel: _forward_impl.7
= control target key start
LH: loop header
LB: loop body
LE: loop exit
PB: predicated region body
PF: predicated region fallthrough
CT: control target
= control target key end

     0   :  { %s385_s12 = smov 0   ;;  %s387_s13 = smov 0   ;;  %s427_s0 = inlined_call_operand.vmem [shape: f32[2,8,32], index: 0, kind: input, shape index: {}]   ;;  %s428_s1 = inlined_call_operand.vmem [shape: f32[1,32], index: 1, kind: input, shape index: {}]   ;;  %s429_s2 = inlined_call_operand.vmem [shape: f32[1,32], index: 2, kind: input, shape index: {}]   ;;  %s430_s3 = inlined_call_operand.vmem [shape: f32[2,8,32], index: 3, kind: output, shape index: {}]  }
   0x1   :  { %s389_s14 = smov 0  }
   0x2 LB: > { %s25_s15 = sadd.s32 1, %s359_s13  ;;  %p308_p0 = scmp.ge.s32.totalorder %s363_s14, 1  ;;  %s363_s14 = sphi %s389_s14, %s13_s14   ;;  %s359_s13 = sphi %s387_s13, %s432_s13   ;;  %s355_s12 = sphi %s385_s12, %s431_s12  }
   0x3   : > { %p27_p1 = scmp.ge.s32.totalorder %s25_s15, 2  ;;  %p155_p2 = scmp.lt.s32.totalorder %s363_s14, 3 }
   0x5   : > { %s434_s15 = smov (%p27_p1, %s25_s15), 0  ;;  %p156_p3 = pnand %p308_p0, %p155_p2 }
   0x6   : > { %p183_p4 = scmp.lt.s32.totalorder (!%p156_p3), %s355_s12, 1  ;;  %vm200_vm0 = vcmask (!%p156_p3), 261120   ;;  %v311_v11 = vld [vmem:[%s428_s1] ss:$0 sm:$0xff] (!%p156_p3) }
   0x7   : > { %159 = sbr.rel (%p156_p3) target bundleno = 332 (0x14c), region = 32  ;;  %v312_v13 = vld [vmem:[%s429_s2] ss:$0 sm:$0xff] (!%p156_p3) }
   0xe   : > { %s436_s12 = smov (!%p183_p4, %s355_s12), 1 }
   0xf   : > { %s309_s16 = sshll.u32 %s436_s12, 3 }
  0x10   : > { %s189_s19 = scalar_lea.vmem %s427_s0, %s309_s16  ;;  %s196_s26 = scalar_lea.vmem %s430_s3, %s309_s16 }
  0x11   : > { %v197_v0 = vld [vmem:[%s189_s19] sm:$0xff] }
  0x12   : > { %v201_v1 = vsel %vm200_vm0, %v197_v0, 0.0 }
  0x13   : > { %202 = vadd.xlane.f32.xlu0 %v201_v1 }
  0xa0   : > { %v203_v2 = vpop.xlane.xlu0 %202 }
  0xa1   : > { %v205_v3 = vmul.f32 0.03125, %v203_v2 }
  0xa3   : > { %v206_v4 = vsub.f32 %v197_v0, %v205_v3 }
  0xa5   : > { %v207_v5 = vmul.f32 %v206_v4, %v206_v4 }
  0xa7   : > { %v208_v6 = vsel %vm200_vm0, %v207_v5, 0.0 }
  0xa8   : > { %209 = vadd.xlane.f32.xlu0 %v208_v6 }
 0x135   : > { %v210_v7 = vpop.xlane.xlu0 %209 }
 0x136   : > { %v211_v8 = vmul.f32 0.03125, %v210_v7 }
 0x138   : > { %v212_v9 = vadd.f32 1e-12, %v211_v8 }
 0x13a   : > { %339 = vrsqrt.f32 %v212_v9 }
 0x144   : > { %v340_v10 = vpop.eup %339 }
 0x145   : > { %v214_v12 = vmul.f32 %v340_v10, %v206_v4 }
 0x147   : > { %v221_v14 = vmul.f32 %v311_v11, %v214_v12 }
 0x149   : > { %v228_v15 = vadd.f32 %v312_v13, %v221_v14 }
 0x14b   : > { %229 = vst.msk [vmem:[%s196_s26] sm:$0xff] %vm200_vm0, %v228_v15 }
 0x14c PF: > { %s13_s14 = sadd.s32 1, %s363_s14   ;;  %s431_s12 = smov %s359_s13 }
 0x14d   : > { %p10_p5 = scmp.ge.s32.totalorder %s13_s14, 4   ;;  %s432_s13 = smov %s434_s15 }
 0x14f   :  { %12 = sbr.rel (!%p10_p5) target bundleno = 2 (0x2), region = 62 }

// kernel: _forward_impl.9
= control target key start
LH: loop header
LB: loop body
LE: loop exit
PB: predicated region body
PF: predicated region fallthrough
CT: control target
= control target key end

     0   :  { %s1256_s15 = smov 0   ;;  %s1258_s16 = smov 0   ;;  %s1433_s0 = inlined_call_operand.vmem [shape: bf16[2,4,8,8], index: 0, kind: input, shape index: {}]   ;;  %s1434_s1 = inlined_call_operand.vmem [shape: bf16[2,4,8,8], index: 1, kind: input, shape index: {}]   ;;  %s1435_s2 = inlined_call_operand.vmem [shape: bf16[2,4,8,8], index: 2, kind: input, shape index: {}]   ;;  %s1436_s3 = inlined_call_operand.vmem [shape: f32[2,1,8], index: 3, kind: input, shape index: {}]   ;;  %s1437_s4 = inlined_call_operand.vmem [shape: bf16[2,8,32], index: 4, kind: output, shape index: {}]  }
   0x1   :  { %s1260_s17 = smov 0  }
   0x2 LB: > { %s33_s18 = sadd.s32 1, %s1218_s16  ;;  %p1057_p0 = scmp.ge.s32.totalorder %s1222_s17, 1  ;;  %s1222_s17 = sphi %s1260_s17, %s14_s17   ;;  %s1218_s16 = sphi %s1258_s16, %s1439_s16   ;;  %s1214_s15 = sphi %s1256_s15, %s1438_s15  }
   0x3   : > { %p35_p1 = scmp.ge.s32.totalorder %s33_s18, 2  ;;  %p231_p2 = scmp.lt.s32.totalorder %s1222_s17, 3 }
   0x5   : > { %s1441_s18 = smov (%p35_p1, %s33_s18), 0  ;;  %p232_p3 = pnand %p1057_p0, %p231_p2 }
   0x6   : > { %p284_p4 = scmp.lt.s32.totalorder (!%p232_p3), %s1214_s15, 1  ;;  %vm335_vm0 = vcmask (!%p232_p3), 64512   ;;  %v1224_v0 = vmov (!%p232_p3), 0.0   ;;  %vm1225_vm1 = vmmov (!%p232_p3), 0   ;;  %vm326_vm2 = vcmask (!%p232_p3), 7168   ;;  %s1228_s6 = smov (!%p232_p3), 8  }
   0x7   : > { %235 = sbr.rel (%p232_p3) target bundleno = 953 (0x3b9), region = 36  ;;  %1095 = vmatprep.subr.bf16.mxu0 (!%p232_p3), %v1224_v0  ;;  %336 = vst.msk [vmem:[#allocation4] sm:$0xff] (!%p232_p3), %vm335_vm0, %v1224_v0  ;;  %337 = vst.msk [vmem:[#allocation4 + $0x8] sm:$0xff] (!%p232_p3), %vm335_vm0, %v1224_v0  ;;  %1101 = vmatprep.subr.bf16.mxu1 (!%p232_p3), %v1224_v0  ;;  %v1226_v13 = vmov (!%p232_p3), -inf   ;;  %v1227_v39 = vmov (!%p232_p3), 0   ;;  %vm672_vm3 = vcmask (!%p232_p3), 1043456  }
   0x8   : > { %338 = vst.msk [vmem:[#allocation4 + $0x10] sm:$0xff] (!%p232_p3), %vm335_vm0, %v1224_v0  ;;  %339 = vst.msk [vmem:[#allocation4 + $0x18] sm:$0xff] (!%p232_p3), %vm335_vm0, %v1224_v0  ;;  %1097 = vmatprep.mubr.msk.bf16.mxu0 (!%p232_p3), %vm1225_vm1, %v1224_v0  ;;  %1103 = vmatprep.mubr.msk.bf16.mxu1 (!%p232_p3), %vm1225_vm1, %v1224_v0  ;;  %s1229_s7 = smov (!%p232_p3), 16   ;;  %s1230_s8 = smov (!%p232_p3), 24   ;;  %vm918_vm4 = vcmask (!%p232_p3), 130048   ;;  %vm920_vm5 = vcmask (!%p232_p3), 195584  }
   0x9   : > { %327 = vst.msk [vmem:[#allocation2] sm:$0xff] (!%p232_p3), %vm326_vm2, %v1226_v13  ;;  %328 = vst.msk [vmem:[#allocation2 + $0x8] sm:$0xff] (!%p232_p3), %vm326_vm2, %v1226_v13  ;;  %1174 = vset.pattern.permute.xlu0 (!%p232_p3), %v1227_v39  ;;  %1175 = vset.pattern.permute.xlu1 (!%p232_p3), %v1227_v39  ;;  %vm923_vm6 = vcmask (!%p232_p3), 257024  }
   0xa   : > { %329 = vst.msk [vmem:[#allocation2 + $0x10] sm:$0xff] (!%p232_p3), %vm326_vm2, %v1226_v13  ;;  %330 = vst.msk [vmem:[#allocation2 + $0x18] sm:$0xff] (!%p232_p3), %vm326_vm2, %v1226_v13 }
   0xb   : > { %331 = vst.msk [vmem:[#allocation3] sm:$0xff] (!%p232_p3), %vm326_vm2, %v1224_v0  ;;  %332 = vst.msk [vmem:[#allocation3 + $0x8] sm:$0xff] (!%p232_p3), %vm326_vm2, %v1224_v0 }
   0xc   : > { %333 = vst.msk [vmem:[#allocation3 + $0x10] sm:$0xff] (!%p232_p3), %vm326_vm2, %v1224_v0  ;;  %334 = vst.msk [vmem:[#allocation3 + $0x18] sm:$0xff] (!%p232_p3), %vm326_vm2, %v1224_v0 }
   0xe   : > { %s1443_s15 = smov (!%p284_p4, %s1214_s15), 1 }
   0xf   : > { %s1291_s19 = sshll.u32 %s1443_s15, 4  ;;  %s313_s28 = scalar_lea.vmem %s1436_s3, %s1443_s15 }
  0x10   : > { %s299_s22 = scalar_lea.vmem %s1434_s1, %s1291_s19  ;;  %s291_s25 = scalar_lea.vmem %s1433_s0, %s1291_s19  ;;  %v1065_v14 = vld [vmem:[%s313_s28] ss:$0 sm:$0xff]  ;;  %v1358_v43 = vld [vmem:[#allocation2 + $0x8] sm:$0xff] }
  0x11   : > { %v344_v1 = vld [vmem:[%s299_s22] sm:$0xf]  ;;  %v345_v2 = vld [vmem:[%s299_s22 + $0x4] sm:$0xf]  ;;  %v346_v5 = vld [vmem:[%s299_s22 + $0x8] sm:$0xf]  ;;  %s307_s5 = scalar_lea.vmem %s1435_s2, %s1291_s19 }
  0x12   : > { %v364_v3 = vsel %vm335_vm0, %v344_v1, 0  ;;  %v410_v4 = vsel %vm335_vm0, %v345_v2, 0  ;;  %v347_v6 = vld [vmem:[%s299_s22 + $0xc] sm:$0xf]  ;;  %v340_v7 = vld [vmem:[%s291_s25] sm:$0xf] }
  0x13   : > { %1096 = vmatpush3.bf16.xpose.msra.mxu0 %v364_v3  ;;  %1102 = vmatpush3.bf16.xpose.msra.mxu1 %v410_v4  ;;  %v341_v8 = vld [vmem:[%s291_s25 + $0x4] sm:$0xf]  ;;  %v456_v9 = vsel %vm335_vm0, %v346_v5, 0  ;;  %v502_v10 = vsel %vm335_vm0, %v347_v6, 0  ;;  %v342_v11 = vld [vmem:[%s291_s25 + $0x8] sm:$0xf] }
  0x14   : > { %1107 = vmatprep.subr.bf16.mxu0 %v1224_v0  ;;  %1113 = vmatprep.subr.bf16.mxu1 %v1224_v0  ;;  %v343_v12 = vld [vmem:[%s291_s25 + $0xc] sm:$0xf]  ;;  %v1353_v40 = vld [vmem:[#allocation2] sm:$0xff]  ;;  %v1368_v47 = vld [vmem:[#allocation2 + $0x10] sm:$0xff]  ;;  %s1064_s9 = sshll.u32 %s1443_s15, 2 }
  0x15   : > { %v1376_v51 = vld [vmem:[#allocation2 + $0x18] sm:$0xff]  ;;  %v348_v56 = vld [vmem:[%s307_s5] sm:$0xf]  ;;  %v349_v58 = vld [vmem:[%s307_s5 + $0x4] sm:$0xf]  ;;  %s320_s12 = scalar_lea.vmem %s1437_s4, %s1064_s9 }
  0x16   : > { %v674_v57 = vsel %vm672_vm3, %v348_v56, 0  ;;  %v720_v59 = vsel %vm672_vm3, %v349_v58, 0  ;;  %v350_v60 = vld [vmem:[%s307_s5 + $0x8] sm:$0xf]  ;;  %v351_v62 = vld [vmem:[%s307_s5 + $0xc] sm:$0xf] }
  0x17   : > { %v766_v61 = vsel %vm672_vm3, %v350_v60, 0  ;;  %v812_v63 = vsel %vm672_vm3, %v351_v62, 0  ;;  %v638_v56 = vld [vmem:[#allocation4 + $0x8] sm:$0xff] }
  0x1a   : > { %1098 = vmatmul.mubr.msk.bf16.vlgmr.msra.gmra.mrb[0].mxu0 %vm335_vm0, %v340_v7  ;;  %1104 = vmatmul.mubr.msk.bf16.vlgmr.msra.gmra.mrb[0].mxu1 %vm335_vm0, %v341_v8 }
  0x1b   : > { %1108 = vmatpush3.bf16.xpose.msra.mxu0 %v456_v9  ;;  %1114 = vmatpush3.bf16.xpose.msra.mxu1 %v502_v10 }
  0x1c   : > { %1109 = vmatprep.mubr.msk.bf16.mxu0 %vm1225_vm1, %v1224_v0  ;;  %1115 = vmatprep.mubr.msk.bf16.mxu1 %vm1225_vm1, %v1224_v0 }
  0x1d   : > { %1119 = vmatprep.subr.bf16.mxu0 %v1224_v0  ;;  %1125 = vmatprep.subr.bf16.mxu1 %v1224_v0 }
  0x22   : > { %1110 = vmatmul.mubr.msk.bf16.vlgmr.msra.gmra.mrb[4].mxu0 %vm335_vm0, %v342_v11  ;;  %1116 = vmatmul.mubr.msk.bf16.vlgmr.msra.gmra.mrb[4].mxu1 %vm335_vm0, %v343_v12 }
  0x23   : > { %1121 = vmatprep.mubr.msk.bf16.mxu0 %vm1225_vm1, %v1224_v0  ;;  %1127 = vmatprep.mubr.msk.bf16.mxu1 %vm1225_vm1, %v1224_v0 }
  0x24   : > { %1120 = vmatpush3.bf16.msra.mxu0 %v674_v57  ;;  %1126 = vmatpush3.bf16.msra.mxu1 %v720_v59 }
  0x25   : > { %1131 = vmatprep.subr.bf16.mxu0 %v1224_v0  ;;  %1137 = vmatprep.subr.bf16.mxu1 %v1224_v0 }
  0xed   : > { %v400_v15 = vpop.f32.mrb[0].mxu0  ;;  %v446_v16 = vpop.f32.mrb[0].mxu1 }
  0xee   : > { %v1337_v17 = vadd.f32 %v1065_v14, %v400_v15  ;;  %v1099_v18 = vpop.f32.mrb[1].mxu0  ;;  %v1339_v19 = vadd.f32 %v1065_v14, %v446_v16  ;;  %v1105_v20 = vpop.f32.mrb[1].mxu1 }
  0xef   : > { %v403_v21 = vpop.f32.mrb[2].mxu0  ;;  %v449_v22 = vpop.f32.mrb[2].mxu1 }
  0xf0   : > { %v1100_v23 = vpop.f32.mrb[3].mxu0  ;;  %v548_v24 = vsel %vm335_vm0, %v1337_v17, -inf  ;;  %v1106_v25 = vpop.f32.mrb[3].mxu1  ;;  %v551_v26 = vsel %vm335_vm0, %v1339_v19, -inf }
  0xf1   : > { %549 = vmax.xlane.f32.xlu0 %v548_v24 }
  0xf5   : > { %552 = vmax.xlane.f32.xlu0 %v551_v26  ;;  %v492_v27 = vpop.f32.mrb[4].mxu0  ;;  %v538_v28 = vpop.f32.mrb[4].mxu1 }
  0xf6   : > { %v1345_v29 = vadd.f32 %v1065_v14, %v492_v27  ;;  %v1111_v30 = vpop.f32.mrb[5].mxu0  ;;  %v1347_v31 = vadd.f32 %v1065_v14, %v538_v28  ;;  %v1117_v32 = vpop.f32.mrb[5].mxu1 }
  0xf7   : > { %v495_v33 = vpop.f32.mrb[6].mxu0  ;;  %v541_v34 = vpop.f32.mrb[6].mxu1 }
  0xf8   : > { %v1112_v35 = vpop.f32.mrb[7].mxu0  ;;  %v554_v36 = vsel %vm335_vm0, %v1345_v29, -inf  ;;  %v1118_v37 = vpop.f32.mrb[7].mxu1  ;;  %v557_v38 = vsel %vm335_vm0, %v1347_v31, -inf  ;;  %v610_v34 = vld [vmem:[#allocation3 + $0x10] sm:$0xff] }
  0xf9   : > { %555 = vmax.xlane.f32.xlu1 %v554_v36 }
  0xfd   : > { %558 = vmax.xlane.f32.xlu1 %v557_v38  ;;  %v611_v38 = vld [vmem:[#allocation3 + $0x18] sm:$0xff] }
 0x17e   : > { %v550_v41 = vpop.xlane.xlu0 %549 }
 0x17f   : > { %v1356_v42 = vmax.f32 %v1353_v40, %v550_v41 }
 0x181   : > { %v564_v44 = vsub.f32 %v1353_v40, %v1356_v42  ;;  %862 = vst.msk [vmem:[#allocation2] sm:$0xff] %vm326_vm2, %v1356_v42  ;;  %578 = vperm.xlu0 %1174, %v1356_v42  }
 0x182   : > { %v553_v45 = vpop.xlane.xlu0 %552 }
 0x183   : > { %v1366_v46 = vmax.f32 %v1358_v43, %v553_v45  ;;  %v568_v30 = vmul.f32 1.442695, %v564_v44 }
 0x185   : > { %v565_v48 = vsub.f32 %v1358_v43, %v1366_v46  ;;  %863 = vst.msk [vmem:[#allocation2 + $0x8] sm:$0xff] %vm326_vm2, %v1366_v46  ;;  %583 = vperm.xlu1 %1175, %v1366_v46   ;;  %v608_v46 = vld [vmem:[#allocation3] sm:$0xff] }
 0x186   : > { %v556_v49 = vpop.xlane.xlu1 %555 }
 0x187   : > { %v562_v50 = vmax.f32 %v1368_v47, %v556_v49 }
 0x189   : > { %v566_v52 = vsub.f32 %v1368_v47, %v562_v50  ;;  %864 = vst.msk [vmem:[#allocation2 + $0x10] sm:$0xff] %vm326_vm2, %v562_v50  ;;  %588 = vperm.xlu1 %1175, %v562_v50  }
 0x18a   : > { %v559_v53 = vpop.xlane.xlu1 %558 }
 0x18b   : > { %v563_v54 = vmax.f32 %v1376_v51, %v559_v53  ;;  %v572_v24 = vmul.f32 1.442695, %v566_v52 }
 0x18d   : > { %v567_v55 = vsub.f32 %v1376_v51, %v563_v54  ;;  %865 = vst.msk [vmem:[#allocation2 + $0x18] sm:$0xff] %vm326_vm2, %v563_v54  ;;  %593 = vperm.xlu1 %1175, %v563_v54  }
 0x18f   : > { %v574_v26 = vmul.f32 1.442695, %v567_v55 }
 0x200   : > { %v579_v1 = vpop.permute.xlu0 %578 }
 0x201   : > { %v596_v2 = vsub.f32 %v1337_v17, %v579_v1 }
 0x203   : > { %v600_v3 = vmul.f32 1.442695, %v596_v2 }
 0x204   : > { %v584_v4 = vpop.permute.xlu1 %583 }
 0x205   : > { %1176 = vpow2.f32 %v600_v3  ;;  %v597_v5 = vsub.f32 %v1339_v19, %v584_v4 }
 0x207   : > { %v602_v6 = vmul.f32 1.442695, %v597_v5 }
 0x208   : > { %v589_v7 = vpop.permute.xlu1 %588 }
 0x209   : > { %1178 = vpow2.f32 %v602_v6  ;;  %v598_v8 = vsub.f32 %v1345_v29, %v589_v7 }
 0x20b   : > { %v604_v9 = vmul.f32 1.442695, %v598_v8  ;;  %v640_v8 = vld [vmem:[#allocation4 + $0x18] sm:$0xff] }
 0x20c   : > { %v594_v10 = vpop.permute.xlu1 %593 }
 0x20d   : > { %1180 = vpow2.f32 %v604_v9  ;;  %v599_v11 = vsub.f32 %v1347_v31, %v594_v10  ;;  %v609_v31 = vld [vmem:[#allocation3 + $0x8] sm:$0xff] }
 0x20f   : > { %v1177_v12 = vpop.eup %1176  ;;  %v606_v13 = vmul.f32 1.442695, %v599_v11 }
 0x210   : > { %v665_v14 = vpack.c.bf16 %v1177_v12, %v1177_v12  ;;  %v616_v25 = vsel %vm335_vm0, %v1177_v12, 0.0 }
 0x211   : > { %1182 = vpow2.f32 %v606_v13 }
 0x212   : > { %1122 = vmatmul.mubr.msk.bf16.vlgmr.msra.gmra.mrb[8].mxu0 %vm335_vm0, %v665_v14  ;;  %1184 = vpow2.f32 %v572_v24 }
 0x213   : > { %v1179_v15 = vpop.eup %1178  ;;  %1132 = vmatpush3.bf16.msra.mxu0 %v766_v61  ;;  %1133 = vmatprep.mubr.msk.bf16.mxu0 %vm1225_vm1, %v1224_v0 }
 0x214   : > { %v619_v16 = vsel %vm335_vm0, %v1179_v15, 0.0  ;;  %v666_v17 = vpack.c.bf16 %v1179_v15, %v1179_v15 }
 0x215   : > { %620 = vadd.xlane.f32.xlu1 %v619_v16 }
 0x216   : > { %1128 = vmatmul.mubr.msk.bf16.vlgmr.msra.gmra.mrb[8].mxu1 %vm335_vm0, %v666_v17 }
 0x217   : > { %v1181_v18 = vpop.eup %1180  ;;  %1138 = vmatpush3.bf16.msra.mxu1 %v812_v63  ;;  %1139 = vmatprep.mubr.msk.bf16.mxu1 %vm1225_vm1, %v1224_v0  ;;  %v570_v0 = vmul.f32 1.442695, %v565_v48  ;;  %v639_v63 = vld [vmem:[#allocation4 + $0x10] sm:$0xff] }
 0x218   : > { %v622_v19 = vsel %vm335_vm0, %v1181_v18, 0.0  ;;  %v667_v20 = vpack.c.bf16 %v1181_v18, %v1181_v18 }
 0x219   : > { %623 = vadd.xlane.f32.xlu0 %v622_v19  ;;  %1186 = vpow2.f32 %v570_v0 }
 0x21a   : > { %1134 = vmatmul.mubr.msk.bf16.vlgmr.msra.gmra.mrb[12].mxu0 %vm335_vm0, %v667_v20  ;;  %1188 = vpow2.f32 %v574_v26  ;;  %v637_v26 = vld [vmem:[#allocation4] sm:$0xff] }
 0x21b   : > { %v1183_v21 = vpop.eup %1182  ;;  %1190 = vpow2.f32 %v568_v30 }
 0x21c   : > { %v625_v22 = vsel %vm335_vm0, %v1183_v21, 0.0  ;;  %v668_v23 = vpack.c.bf16 %v1183_v21, %v1183_v21  ;;  %v1185_v27 = vpop.eup %1184 }
 0x21d   : > { %626 = vadd.xlane.f32.xlu1 %v625_v22  ;;  %v614_v36 = vmul.f32 %v1185_v27, %v610_v34 }
 0x21e   : > { %1140 = vmatmul.mubr.msk.bf16.vlgmr.msra.gmra.mrb[12].mxu1 %vm335_vm0, %v668_v23 }
 0x221   : > { %617 = vadd.xlane.f32.xlu1 %v616_v25 }
 0x223   : > { %v1187_v28 = vpop.eup %1186 }
 0x224   : > { %v1189_v29 = vpop.eup %1188  ;;  %v613_v32 = vmul.f32 %v1187_v28, %v609_v31 }
 0x225   : > { %v615_v41 = vmul.f32 %v1189_v29, %v611_v38  ;;  %v1191_v43 = vpop.eup %1190 }
 0x226   : > { %v612_v44 = vmul.f32 %v1191_v43, %v608_v46 }
 0x22f   : > { %653 = vperm.xlu0 %1174, %v1185_v27  }
 0x232   : > { %648 = vperm.xlu1 %1175, %v1187_v28  }
 0x236   : > { %658 = vperm.xlu1 %1175, %v1189_v29  }
 0x2a2   : > { %v621_v33 = vpop.xlane.xlu1 %620 }
 0x2a3   : > { %v629_v35 = vadd.f32 %v621_v33, %v613_v32 }
 0x2a5   : > { %634 = vst.msk [vmem:[#allocation3 + $0x8] sm:$0xff] %vm326_vm2, %v629_v35 }
 0x2a6   : > { %v624_v37 = vpop.xlane.xlu0 %623 }
 0x2a7   : > { %v630_v39 = vadd.f32 %v624_v37, %v614_v36 }
 0x2a9   : > { %635 = vst.msk [vmem:[#allocation3 + $0x10] sm:$0xff] %vm326_vm2, %v630_v39 }
 0x2aa   : > { %v627_v45 = vpop.xlane.xlu1 %626 }
 0x2ab   : > { %v631_v40 = vadd.f32 %v627_v45, %v615_v41 }
 0x2ac   : > { %v874_v42 = vld [vmem:[#allocation3 + $0x8] sm:$0xff] }
 0x2ad   : > { %636 = vst.msk [vmem:[#allocation3 + $0x18] sm:$0xff] %vm326_vm2, %v631_v40  ;;  %1192 = vrcp.f32 %v874_v42 }
 0x2ae   : > { %v618_v47 = vpop.xlane.xlu1 %617  ;;  %v654_v1 = vpop.permute.xlu0 %653 }
 0x2af   : > { %v628_v48 = vadd.f32 %v618_v47, %v612_v44  ;;  %v663_v6 = vmul.f32 %v654_v1, %v639_v63 }
 0x2b0   : > { %v875_v49 = vld [vmem:[#allocation3 + $0x10] sm:$0xff] }
 0x2b1   : > { %633 = vst.msk [vmem:[#allocation3] sm:$0xff] %vm326_vm2, %v628_v48  ;;  %1194 = vrcp.f32 %v875_v49 }
 0x2b2   : > { %v649_v57 = vpop.permute.xlu1 %648 }
 0x2b3   : > { %v662_v61 = vmul.f32 %v649_v57, %v638_v56 }
 0x2b4   : > { %v876_v50 = vld [vmem:[#allocation3 + $0x18] sm:$0xff] }
 0x2b5   : > { %1196 = vrcp.f32 %v876_v50 }
 0x2b6   : > { %v659_v9 = vpop.permute.xlu1 %658 }
 0x2b7   : > { %v1193_v51 = vpop.eup %1192  ;;  %v664_v14 = vmul.f32 %v659_v9, %v640_v8 }
 0x2b8   : > { %888 = vperm.xlu1 %1175, %v1193_v51   ;;  %v873_v52 = vld [vmem:[#allocation3] sm:$0xff] }
 0x2b9   : > { %1198 = vrcp.f32 %v873_v52 }
 0x2bb   : > { %v1195_v53 = vpop.eup %1194 }
 0x2bc   : > { %893 = vperm.xlu1 %1175, %v1195_v53  }
 0x2bf   : > { %v1197_v54 = vpop.eup %1196 }
 0x2c0   : > { %643 = vperm.xlu1 %1175, %v1191_v43   ;;  %898 = vperm.xlu0 %1174, %v1197_v54  }
 0x2c3   : > { %v1199_v55 = vpop.eup %1198 }
 0x2c4   : > { %883 = vperm.xlu0 %1174, %v1199_v55  }
 0x2e5   : > { %v710_v58 = vpop.f32.mrb[8].mxu0 }
 0x2e6   : > { %v1123_v59 = vpop.f32.mrb[9].mxu0 }
 0x2e7   : > { %v713_v60 = vpop.f32.mrb[10].mxu0 }
 0x2e8   : > { %v1124_v62 = vpop.f32.mrb[11].mxu0 }
 0x2e9   : > { %v756_v2 = vpop.f32.mrb[8].mxu1 }
 0x2ea   : > { %v855_v3 = vadd.f32 %v756_v2, %v662_v61  ;;  %v1129_v4 = vpop.f32.mrb[9].mxu1 }
 0x2eb   : > { %v759_v5 = vpop.f32.mrb[10].mxu1 }
 0x2ec   : > { %859 = vst.msk [vmem:[#allocation4 + $0x8] sm:$0xff] %vm335_vm0, %v855_v3  ;;  %v1130_v7 = vpop.f32.mrb[11].mxu1 }
 0x2ed   : > { %v802_v10 = vpop.f32.mrb[12].mxu0 }
 0x2ee   : > { %v856_v11 = vadd.f32 %v802_v10, %v663_v6  ;;  %v1135_v12 = vpop.f32.mrb[13].mxu0 }
 0x2ef   : > { %v805_v13 = vpop.f32.mrb[14].mxu0 }
 0x2f0   : > { %860 = vst.msk [vmem:[#allocation4 + $0x10] sm:$0xff] %vm335_vm0, %v856_v11  ;;  %v1136_v15 = vpop.f32.mrb[15].mxu0 }
 0x2f1   : > { %v848_v16 = vpop.f32.mrb[12].mxu1 }
 0x2f2   : > { %v857_v17 = vadd.f32 %v848_v16, %v664_v14  ;;  %v1141_v18 = vpop.f32.mrb[13].mxu1 }
 0x2f3   : > { %v851_v19 = vpop.f32.mrb[14].mxu1  ;;  %v870_v21 = vld [vmem:[#allocation4 + $0x8] sm:$0xff] }
 0x2f4   : > { %861 = vst.msk [vmem:[#allocation4 + $0x18] sm:$0xff] %vm335_vm0, %v857_v17  ;;  %v1142_v20 = vpop.f32.mrb[15].mxu1 }
 0x2f7   : > { %v871_v25 = vld [vmem:[#allocation4 + $0x10] sm:$0xff] }
 0x2fb   : > { %v872_v28 = vld [vmem:[#allocation4 + $0x18] sm:$0xff] }
 0x337   : > { %v889_v22 = vpop.permute.xlu1 %888 }
 0x338   : > { %v902_v23 = vmul.f32 %v889_v22, %v870_v21 }
 0x33a   : > { %906 = vrot.lane.b32.xlu1 %v902_v23, %s1228_s6 }
 0x33b   : > { %v894_v24 = vpop.permute.xlu1 %893 }
 0x33c   : > { %v903_v0 = vmul.f32 %v894_v24, %v871_v25 }
 0x33e   : > { %910 = vrot.lane.b32.xlu0 %v903_v0, %s1229_s7 }
 0x33f   : > { %v899_v27 = vpop.permute.xlu0 %898  ;;  %v644_v29 = vpop.permute.xlu1 %643 }
 0x340   : > { %v904_v30 = vmul.f32 %v899_v27, %v872_v28  ;;  %v661_v31 = vmul.f32 %v644_v29, %v637_v26 }
 0x342   : > { %v854_v32 = vadd.f32 %v710_v58, %v661_v31  ;;  %914 = vrot.lane.b32.xlu1 %v904_v30, %s1230_s8 }
 0x343   : > { %v884_v33 = vpop.permute.xlu0 %883 }
 0x344   : > { %858 = vst.msk [vmem:[#allocation4] sm:$0xff] %vm335_vm0, %v854_v32 }
 0x34b   : > { %v869_v34 = vld [vmem:[#allocation4] sm:$0xff] }
 0x34c   : > { %v901_v36 = vmul.f32 %v884_v33, %v869_v34 }
 0x3ac   : > { %v907_v35 = vpop.permute.xlu1 %906 }
 0x3ad   : > { %v917_v38 = vsel %vm335_vm0, %v901_v36, %v907_v35 }
 0x3b0   : > { %v911_v37 = vpop.permute.xlu0 %910 }
 0x3b1   : > { %v919_v39 = vsel %vm918_vm4, %v917_v38, %v911_v37 }
 0x3b4   : > { %v915_v41 = vpop.permute.xlu1 %914 }
 0x3b5   : > { %v921_v43 = vsel %vm920_vm5, %v919_v39, %v915_v41 }
 0x3b6   : > { %v922_v45 = vpack.c.bf16 %v921_v43, %v921_v43 }
 0x3b8   : > { %924 = vst.msk [vmem:[%s320_s12] sm:$0xf] %vm923_vm6, %v922_v45 }
 0x3b9 PF: > { %s14_s17 = sadd.s32 1, %s1222_s17   ;;  %s1438_s15 = smov %s1218_s16 }
 0x3ba   : > { %p11_p5 = scmp.ge.s32.totalorder %s14_s17, 4   ;;  %s1439_s16 = smov %s1441_s18 }
 0x3bc   :  { %13 = sbr.rel (!%p11_p5) target bundleno = 2 (0x2), region = 83 }

// kernel: _forward_impl.10
= control target key start
LH: loop header
LB: loop body
LE: loop exit
PB: predicated region body
PF: predicated region fallthrough
CT: control target
= control target key end

     0   :  { %s1067_s21 = smov 0   ;;  %s1069_s22 = smov 0   ;;  %s1163_s0 = inlined_call_operand.vmem [shape: f32[2,8,32], index: 0, kind: input, shape index: {}]   ;;  %s1164_s1 = inlined_call_operand.vmem [shape: bf16[2,8,32], index: 1, kind: input, shape index: {}]   ;;  %s1165_s2 = inlined_call_operand.vmem [shape: bf16[32,32], index: 2, kind: input, shape index: {}]   ;;  %s1166_s3 = inlined_call_operand.vmem [shape: f32[1,32], index: 3, kind: input, shape index: {}]   ;;  %s1167_s4 = inlined_call_operand.vmem [shape: f32[1,32], index: 4, kind: input, shape index: {}]   ;;  %s1168_s5 = inlined_call_operand.vmem [shape: f32[1,32], index: 5, kind: input, shape index: {}]   ;;  %s1169_s6 = inlined_call_operand.vmem [shape: bf16[32,64], index: 6, kind: input, shape index: {}]   ;;  %s1170_s7 = inlined_call_operand.vmem [shape: f32[1,64], index: 7, kind: input, shape index: {}]   ;;  %s1171_s8 = inlined_call_operand.vmem [shape: bf16[64,32], index: 8, kind: input, shape index: {}]   ;;  %s1172_s9 = inlined_call_operand.vmem [shape: f32[1,32], index: 9, kind: input, shape index: {}]   ;;  %s1173_s10 = inlined_call_operand.vmem [shape: f32[1,32], index: 10, kind: input, shape index: {}]   ;;  %s1174_s11 = inlined_call_operand.vmem [shape: f32[1,32], index: 11, kind: input, shape index: {}]   ;;  %s1175_s12 = inlined_call_operand.vmem [shape: f32[2,8,32], index: 12, kind: output, shape index: {}]  }
   0x1   :  { %s1071_s23 = smov 0  }
   0x2 LB: > { %s34_s24 = sadd.s32 1, %s994_s22  ;;  %p871_p0 = scmp.ge.s32.totalorder %s998_s23, 1  ;;  %s998_s23 = sphi %s1071_s23, %s22_s23   ;;  %s994_s22 = sphi %s1069_s22, %s1177_s22   ;;  %s990_s21 = sphi %s1067_s21, %s1176_s21  }
   0x3   : > { %p36_p1 = scmp.ge.s32.totalorder %s34_s24, 2  ;;  %p394_p2 = scmp.lt.s32.totalorder %s998_s23, 3 }
   0x5   : > { %s1179_s24 = smov (%p36_p1, %s34_s24), 0  ;;  %p395_p3 = pnand %p871_p0, %p394_p2 }
   0x6   : > { %v960_v0 = vld [vmem:[%s1165_s2] sm:$0xff] (!%p395_p3)   ;;  %v1000_v1 = vmov (!%p395_p3), 0.0   ;;  %v961_v2 = vld [vmem:[%s1165_s2 + $0x8] sm:$0xff] (!%p395_p3)   ;;  %vm1001_vm0 = vmmov (!%p395_p3), 0   ;;  %p447_p4 = scmp.lt.s32.totalorder (!%p395_p3), %s990_s21, 1  ;;  %vm494_vm1 = vcmask (!%p395_p3), 261120  }
   0x7   : > { %398 = sbr.rel (%p395_p3) target bundleno = 1343 (0x53f), region = 68  ;;  %906 = vmatprep.subr.bf16.mxu1 (!%p395_p3), %v1000_v1  ;;  %922 = vmatprep.subr.bf16.mxu0 (!%p395_p3), %v1000_v1  ;;  %v875_v4 = vld [vmem:[%s1166_s3] ss:$0 sm:$0xff] (!%p395_p3)  ;;  %v963_v19 = vld [vmem:[%s1169_s6 + $0x8] sm:$0xff] (!%p395_p3)   ;;  %v966_v32 = vld [vmem:[%s1171_s8 + $0x10] sm:$0xff] (!%p395_p3)   ;;  %vm703_vm3 = vcmask (!%p395_p3), 523264  }
   0x8   : > { %907 = vmatpush3.bf16.msra.mxu1 (!%p395_p3), %v960_v0  ;;  %910 = vmatprep.mubr.msk.bf16.mxu1 (!%p395_p3), %vm1001_vm0, %v1000_v1  ;;  %v962_v18 = vld [vmem:[%s1169_s6] sm:$0xff] (!%p395_p3)   ;;  %v965_v31 = vld [vmem:[%s1171_s8 + $0x8] sm:$0xff] (!%p395_p3)   ;;  %v967_v33 = vld [vmem:[%s1171_s8 + $0x18] sm:$0xff] (!%p395_p3)  }
   0x9   : > { %908 = vmatprep.subr.bf16.mxu1 (!%p395_p3), %v1000_v1  ;;  %930 = vmatprep.mubr.msk.bf16.mxu0 (!%p395_p3), %vm1001_vm0, %v1000_v1  ;;  %v879_v24 = vld [vmem:[%s1167_s4] ss:$0 sm:$0xff] (!%p395_p3) }
   0xa   : > { %v880_v26 = vld [vmem:[%s1168_s5] ss:$0 sm:$0xff] (!%p395_p3) }
   0xb   : > { %v964_v30 = vld [vmem:[%s1171_s8] sm:$0xff] (!%p395_p3)  }
   0xc   : > { %909 = vmatpush3.bf16.msra.mxu1 (!%p395_p3), %v961_v2  ;;  %923 = vmatpush3.bf16.msra.mxu0 (!%p395_p3), %v964_v30  ;;  %v881_v34 = vld [vmem:[%s1170_s7] ss:$0 sm:$0xff] (!%p395_p3) }
   0xd   : > { %914 = vmatprep.subr.bf16.mxu1 (!%p395_p3), %v1000_v1  ;;  %924 = vmatprep.subr.bf16.mxu0 (!%p395_p3), %v1000_v1  ;;  %v885_v2 = vld [vmem:[%s1172_s9] ss:$0 sm:$0xff] (!%p395_p3) }
   0xe   : > { %s1181_s21 = smov (!%p447_p4, %s990_s21), 1 }
   0xf   : > { %s873_s29 = sshll.u32 %s1181_s21, 2  ;;  %s872_s15 = sshll.u32 %s1181_s21, 3 }
  0x10   : > { %s460_s14 = scalar_lea.vmem %s1164_s1, %s873_s29  ;;  %s453_s18 = scalar_lea.vmem %s1163_s0, %s872_s15  ;;  %925 = vmatpush3.bf16.msra.mxu0 %v965_v31 }
  0x11   : > { %v470_v3 = vld [vmem:[%s460_s14] sm:$0xf]  ;;  %926 = vmatprep.subr.bf16.mxu0 %v1000_v1  ;;  %s467_s25 = scalar_lea.vmem %s1175_s12, %s872_s15 }
  0x12   : > { %911 = vmatmul.mubr.msk.bf16.vlgmr.msra.gmra.mrb[0].mxu1 %vm494_vm1, %v470_v3  ;;  %v469_v6 = vld [vmem:[%s453_s18] sm:$0xff] }
  0x13   : > { %918 = vmatprep.mubr.msk.bf16.mxu1 %vm1001_vm0, %v1000_v1  ;;  %915 = vmatpush3.bf16.msra.mxu1 %v962_v18 }
  0x14   : > { %916 = vmatprep.subr.bf16.mxu1 %v1000_v1  ;;  %927 = vmatpush3.bf16.msra.mxu0 %v966_v32 }
  0x15   : > { %928 = vmatprep.subr.bf16.mxu0 %v1000_v1 }
  0x17   : > { %917 = vmatpush3.bf16.msra.mxu1 %v963_v19  ;;  %v891_v19 = vld [vmem:[%s1173_s10] ss:$0 sm:$0xff] }
  0x18   : > { %929 = vmatpush3.bf16.msra.mxu0 %v967_v33 }
  0xe5   : > { %v532_v5 = vpop.f32.mrb[0].mxu1 }
  0xe6   : > { %v533_v7 = vadd.f32 %v875_v4, %v532_v5  ;;  %v912_v8 = vpop.f32.mrb[1].mxu1 }
  0xe7   : > { %v535_v9 = vpop.f32.mrb[2].mxu1 }
  0xe8   : > { %v913_v10 = vpop.f32.mrb[3].mxu1  ;;  %v538_v11 = vadd.f32 %v533_v7, %v469_v6 }
  0xea   : > { %v541_v12 = vsel %vm494_vm1, %v538_v11, 0.0 }
  0xeb   : > { %542 = vadd.xlane.f32.xlu0 %v541_v12 }
 0x178   : > { %v543_v13 = vpop.xlane.xlu0 %542 }
 0x179   : > { %v545_v14 = vmul.f32 0.03125, %v543_v13 }
 0x17b   : > { %v546_v15 = vsub.f32 %v538_v11, %v545_v14 }
 0x17d   : > { %v547_v16 = vmul.f32 %v546_v15, %v546_v15 }
 0x17f   : > { %v548_v17 = vsel %vm494_vm1, %v547_v16, 0.0 }
 0x180   : > { %549 = vadd.xlane.f32.xlu0 %v548_v17 }
 0x20d   : > { %v550_v20 = vpop.xlane.xlu0 %549 }
 0x20e   : > { %v551_v21 = vmul.f32 0.03125, %v550_v20 }
 0x210   : > { %v552_v22 = vadd.f32 1e-12, %v551_v21  ;;  %v892_v21 = vld [vmem:[%s1174_s11] ss:$0 sm:$0xff] }
 0x212   : > { %968 = vrsqrt.f32 %v552_v22 }
 0x21c   : > { %v969_v23 = vpop.eup %968 }
 0x21d   : > { %v554_v25 = vmul.f32 %v969_v23, %v546_v15 }
 0x21f   : > { %v561_v27 = vmul.f32 %v879_v24, %v554_v25 }
 0x221   : > { %v568_v28 = vadd.f32 %v880_v26, %v561_v27 }
 0x223   : > { %v569_v29 = vpack.c.bf16 %v568_v28, %v568_v28 }
 0x225   : > { %919 = vmatmul.mubr.msk.bf16.vlgmr.msra.gmra.mrb[4].mxu1 %vm494_vm1, %v569_v29 }
 0x2f8   : > { %v630_v35 = vpop.f32.mrb[4].mxu1 }
 0x2f9   : > { %v631_v36 = vadd.f32 %v881_v34, %v630_v35  ;;  %v920_v37 = vpop.f32.mrb[5].mxu1 }
 0x2fa   : > { %v633_v38 = vpop.f32.mrb[6].mxu1 }
 0x2fb   : > { %v637_v39 = vmul.f32 0.70710677, %v631_v36  ;;  %v921_v40 = vpop.f32.mrb[7].mxu1  ;;  %v636_v62 = vmul.f32 0.5, %v631_v36 }
 0x2fd   : > { %v638_v41 = vand.u32 2147483647, %v637_v39  ;;  %vm658_vm2 = vcmp.ge.f32.partialorder %v637_v39, 0.0 }
 0x2ff   : > { %v639_v42 = vmul.f32 0.3275911, %v638_v41  ;;  %v652_v44 = vsub.f32 0.0, %v638_v41 }
 0x301   : > { %v640_v43 = vadd.f32 1.0, %v639_v42  ;;  %v653_v46 = vmul.f32 %v652_v44, %v638_v41 }
 0x303   : > { %970 = vrcp.f32 %v640_v43  ;;  %v654_v49 = vmul.f32 1.442695, %v653_v46 }
 0x305   : > { %972 = vpow2.f32 %v654_v49 }
 0x30d   : > { %v971_v45 = vpop.eup %970 }
 0x30e   : > { %v643_v47 = vmul.f32 1.0614054, %v971_v45 }
 0x30f   : > { %v973_v57 = vpop.eup %972 }
 0x310   : > { %v644_v48 = vadd.f32 -1.4531521, %v643_v47 }
 0x312   : > { %v645_v50 = vmul.f32 %v971_v45, %v644_v48 }
 0x314   : > { %v646_v51 = vadd.f32 1.4214138, %v645_v50 }
 0x316   : > { %v647_v52 = vmul.f32 %v971_v45, %v646_v51 }
 0x318   : > { %v648_v53 = vadd.f32 -0.28449672, %v647_v52 }
 0x31a   : > { %v649_v54 = vmul.f32 %v971_v45, %v648_v53 }
 0x31c   : > { %v650_v55 = vadd.f32 0.2548296, %v649_v54 }
 0x31e   : > { %v651_v56 = vmul.f32 %v971_v45, %v650_v55 }
 0x320   : > { %v656_v58 = vmul.f32 %v973_v57, %v651_v56 }
 0x322   : > { %v657_v59 = vsub.f32 1.0, %v656_v58 }
 0x324   : > { %v659_v60 = vsub.f32 0.0, %v657_v59 }
 0x326   : > { %v660_v61 = vsel %vm658_vm2, %v657_v59, %v659_v60 }
 0x327   : > { %v661_v63 = vadd.f32 1.0, %v660_v61 }
 0x329   : > { %v662_v0 = vmul.f32 %v661_v63, %v636_v62 }
 0x32b   : > { %v663_v1 = vpack.c.bf16 %v662_v0, %v662_v0 }
 0x32d   : > { %931 = vmatmul.mubr.msk.bf16.vlgmr.msra.gmra.mrb[0].mxu0 %vm703_vm3, %v663_v1 }
 0x400   : > { %v741_v3 = vpop.f32.mrb[0].mxu0 }
 0x401   : > { %v742_v4 = vadd.f32 %v885_v2, %v741_v3  ;;  %v932_v5 = vpop.f32.mrb[1].mxu0 }
 0x402   : > { %v744_v6 = vpop.f32.mrb[2].mxu0 }
 0x403   : > { %v933_v7 = vpop.f32.mrb[3].mxu0  ;;  %v747_v8 = vadd.f32 %v742_v4, %v568_v28 }
 0x405   : > { %v750_v9 = vsel %vm494_vm1, %v747_v8, 0.0 }
 0x406   : > { %751 = vadd.xlane.f32.xlu1 %v750_v9 }
 0x493   : > { %v752_v10 = vpop.xlane.xlu1 %751 }
 0x494   : > { %v753_v11 = vmul.f32 0.03125, %v752_v10 }
 0x496   : > { %v754_v12 = vsub.f32 %v747_v8, %v753_v11 }
 0x498   : > { %v755_v13 = vmul.f32 %v754_v12, %v754_v12 }
 0x49a   : > { %v756_v14 = vsel %vm494_vm1, %v755_v13, 0.0 }
 0x49b   : > { %757 = vadd.xlane.f32.xlu1 %v756_v14 }
 0x528   : > { %v758_v15 = vpop.xlane.xlu1 %757 }
 0x529   : > { %v759_v16 = vmul.f32 0.03125, %v758_v15 }
 0x52b   : > { %v760_v17 = vadd.f32 1e-12, %v759_v16 }
 0x52d   : > { %974 = vrsqrt.f32 %v760_v17 }
 0x537   : > { %v975_v18 = vpop.eup %974 }
 0x538   : > { %v762_v20 = vmul.f32 %v975_v18, %v754_v12 }
 0x53a   : > { %v769_v22 = vmul.f32 %v891_v19, %v762_v20 }
 0x53c   : > { %v776_v23 = vadd.f32 %v892_v21, %v769_v22 }
 0x53e   : > { %777 = vst.msk [vmem:[%s467_s25] sm:$0xff] %vm494_vm1, %v776_v23 }
 0x53f PF: > { %s22_s23 = sadd.s32 1, %s998_s23   ;;  %s1176_s21 = smov %s994_s22 }
 0x540   : > { %p19_p5 = scmp.ge.s32.totalorder %s22_s23, 4   ;;  %s1177_s22 = smov %s1179_s24 }
 0x542   :  { %21 = sbr.rel (!%p19_p5) target bundleno = 2 (0x2), region = 101 }

// kernel: _forward_impl.13
= control target key start
LH: loop header
LB: loop body
LE: loop exit
PB: predicated region body
PF: predicated region fallthrough
CT: control target
= control target key end

     0   :  { %s1330_s0 = inlined_call_operand.vmem [shape: f32[2,8,32], index: 0, kind: input, shape index: {}]   ;;  %s1331_s1 = inlined_call_operand.vmem [shape: bf16[2,8,32], index: 1, kind: input, shape index: {}]   ;;  %s1332_s2 = inlined_call_operand.vmem [shape: bf16[32,32], index: 2, kind: input, shape index: {}]   ;;  %s1333_s3 = inlined_call_operand.vmem [shape: f32[1,32], index: 3, kind: input, shape index: {}]   ;;  %s1334_s4 = inlined_call_operand.vmem [shape: f32[1,32], index: 4, kind: input, shape index: {}]   ;;  %s1335_s5 = inlined_call_operand.vmem [shape: f32[1,32], index: 5, kind: input, shape index: {}]   ;;  %s1336_s6 = inlined_call_operand.vmem [shape: bf16[32,64], index: 6, kind: input, shape index: {}]   ;;  %s1337_s7 = inlined_call_operand.vmem [shape: f32[1,64], index: 7, kind: input, shape index: {}]   ;;  %s1338_s8 = inlined_call_operand.vmem [shape: bf16[64,32], index: 8, kind: input, shape index: {}]   ;;  %s1339_s9 = inlined_call_operand.vmem [shape: f32[1,32], index: 9, kind: input, shape index: {}]   ;;  %s1340_s10 = inlined_call_operand.vmem [shape: f32[1,32], index: 10, kind: input, shape index: {}]   ;;  %s1341_s11 = inlined_call_operand.vmem [shape: f32[1,32], index: 11, kind: input, shape index: {}]   ;;  %s1342_s12 = inlined_call_operand.hbm [shape: f32[2,8,32], index: 12, kind: output, shape index: {}]  }
   0x1   :  { %1345 = sst [smem:[#allocation7_spill]] %s1330_s0 }
   0x2   :  { %1346 = sst [smem:[#allocation8_spill]] %s1332_s2 }
   0x3   :  { %17 = vsyncpa [#allocation3], 0 }
   0x4   :  { %19 = vsyncpa [#allocation3 + $0x1], 0  ;;  %s1163_s21 = smov 0   ;;  %s1165_s22 = smov 0  }
   0x5   :  { %s1167_s23 = smov 0   ;;  %s1169_s24 = smov 0  }
   0x6   :  { %s1171_s25 = smov 0   ;;  %s1173_s26 = smov 0  }
   0x7 LB: > { %1347 = sst [smem:[#allocation5_spill]] %s1089_s25  ;;  %s873_s27 = sadd.s32 4294967295, %s1093_s26   ;;  %s1093_s26 = sphi %s1173_s26, %s25_s26   ;;  %s1089_s25 = sphi %s1171_s25, %s1354_s25   ;;  %s1085_s24 = sphi %s1169_s24, %s1353_s24   ;;  %s1081_s23 = sphi %s1167_s23, %s1357_s23   ;;  %s1077_s22 = sphi %s1165_s22, %s1356_s22   ;;  %s1073_s21 = sphi %s1163_s21, %s1355_s21  }
   0x8   : > { %s874_s28 = sadd.s32 4294967294, %s1093_s26   ;;  %s37_s29 = sadd.s32 1, %s1089_s25 }
   0x9   : > { %s312_s30 = sadd.s32 1, %s1081_s23  ;;  %p39_p0 = scmp.ge.s32.totalorder %s37_s29, 2 }
   0xa   : > { %p322_p1 = scmp.ne.s32.totalorder %s1081_s23, %s1077_s22  ;;  %p323_p2 = scmp.eq.s32.totalorder %s873_s27, 1 }
   0xb   : > { %p328_p3 = scmp.ne.s32.totalorder %s1077_s22, %s1073_s21  ;;  %s1359_s29 = smov (%p39_p0, %s37_s29), 0 }
   0xc   : > { %1348 = sst [smem:[#allocation6_spill]] %s1359_s29  ;;  %p1203_p4 = por %p323_p2, %p322_p1 }
   0xd   : > { %p329_p5 = scmp.eq.s32.totalorder %s874_s28, 1  ;;  %s307_s14 = ssub.s32 %s1089_s25, %s1359_s29 }
   0xe   : > { %p877_p6 = scmp.ge.s32.totalorder %s1093_s26, 1  ;;  %p310_p7 = scmp.eq.s32.totalorder %s307_s14, 0 }
   0xf   : > { %p1210_p8 = por %p329_p5, %p328_p3  ;;  %p397_p9 = scmp.lt.s32.totalorder %s1093_s26, 3 }
  0x10   : > { %s1216_s16 = scalar_select %p310_p7, %s1081_s23, %s312_s30  }
  0x11   : > { %p398_p10 = pnand %p877_p6, %p397_p9 }
  0x12   : > { %s1351_s2 = sld [smem:[#allocation8_spill]] (!%p398_p10)  ;;  %v1095_v1 = vmov (!%p398_p10), 0.0   ;;  %vm1096_vm0 = vmmov (!%p398_p10), 0   ;;  %p448_p11 = scmp.lt.s32.totalorder (!%p398_p10), %s1085_s24, 1  ;;  %vm488_vm1 = vcmask (!%p398_p10), 261120   ;;  %v1001_v18 = vld [vmem:[%s1336_s6] sm:$0xff] (!%p398_p10)  }
  0x13   : > { %401 = sbr.rel (%p398_p10) target bundleno = 1370 (0x55a), region = 68  ;;  %914 = vmatprep.subr.bf16.mxu1 (!%p398_p10), %v1095_v1  ;;  %930 = vmatprep.subr.bf16.mxu0 (!%p398_p10), %v1095_v1  ;;  %s1352_s0 = sld [smem:[#allocation7_spill]] (!%p398_p10)  ;;  %v881_v4 = vld [vmem:[%s1333_s3] ss:$0 sm:$0xff] (!%p398_p10)  ;;  %v1002_v19 = vld [vmem:[%s1336_s6 + $0x8] sm:$0xff] (!%p398_p10)   ;;  %v1005_v32 = vld [vmem:[%s1338_s8 + $0x10] sm:$0xff] (!%p398_p10)  }
  0x14   : > { %918 = vmatprep.mubr.msk.bf16.mxu1 (!%p398_p10), %vm1096_vm0, %v1095_v1  ;;  %938 = vmatprep.mubr.msk.bf16.mxu0 (!%p398_p10), %vm1096_vm0, %v1095_v1  ;;  %v885_v24 = vld [vmem:[%s1334_s4] ss:$0 sm:$0xff] (!%p398_p10)  ;;  %v1004_v31 = vld [vmem:[%s1338_s8 + $0x8] sm:$0xff] (!%p398_p10)   ;;  %v1006_v33 = vld [vmem:[%s1338_s8 + $0x18] sm:$0xff] (!%p398_p10)   ;;  %vm697_vm3 = vcmask (!%p398_p10), 523264   ;;  %s445_s19 = sand.u32 (!%p398_p10), 1, %s1077_s22  }
  0x15   : > { %v886_v26 = vld [vmem:[%s1335_s5] ss:$0 sm:$0xff] (!%p398_p10)  ;;  %s878_s20 = sshll.u32 (!%p398_p10), %s445_s19, 3 }
  0x16   : > { %v1003_v30 = vld [vmem:[%s1338_s8] sm:$0xff] (!%p398_p10)   ;;  %s447_s30 = scalar_lea.vmem (!%p398_p10), [#allocation2], %s878_s20 }
  0x17   : > { %931 = vmatpush3.bf16.msra.mxu0 (!%p398_p10), %v1003_v30  ;;  %v887_v34 = vld [vmem:[%s1337_s7] ss:$0 sm:$0xff] (!%p398_p10)  ;;  %s787_s14 = sshll.u32 (!%p398_p10), %s447_s30, 4  ;;  %s1284_s14 = int_to_ptr.vmem [resolvable:$true] %s787_s14 }
  0x18   : > { %v999_v0 = vld [vmem:[%s1351_s2] sm:$0xff] (!%p398_p10)   ;;  %v1000_v2 = vld [vmem:[%s1351_s2 + $0x8] sm:$0xff] (!%p398_p10)   ;;  %932 = vmatprep.subr.bf16.mxu0 (!%p398_p10), %v1095_v1  ;;  %s1015_s25 = scalar_lea.vmem (!%p398_p10), %s1284_s14, 128 }
  0x19   : > { %915 = vmatpush3.bf16.msra.mxu1 (!%p398_p10), %v999_v0  ;;  %p1016_p12 = scmp.ne.s32.totalorder (!%p398_p10), %s1284_s14, %s1015_s25 }
  0x1a   : > { %916 = vmatprep.subr.bf16.mxu1 %v1095_v1  ;;  %s449_s27 = scalar_select %p448_p11, %s1085_s24, 1 }
  0x1b   : > { %933 = vmatpush3.bf16.msra.mxu0 %v1004_v31  ;;  %p1017_p13 = pnand %p1016_p12, %p1203_p4 }
  0x1c   : > { %s880_s28 = sshll.u32 %s449_s27, 2  ;;  %s879_s18 = sshll.u32 %s449_s27, 3  ;;  %934 = vmatprep.subr.bf16.mxu0 %v1095_v1 }
  0x1d   : > { %917 = vmatpush3.bf16.msra.mxu1 %v1000_v2  ;;  %s461_s17 = scalar_lea.vmem %s1331_s1, %s880_s28  ;;  %s454_s2 = scalar_lea.vmem %s1352_s0, %s879_s18  ;;  %v891_v2 = vld [vmem:[%s1339_s9] ss:$0 sm:$0xff] }
  0x1e   : > { %922 = vmatprep.subr.bf16.mxu1 %v1095_v1  ;;  %v464_v3 = vld [vmem:[%s461_s17] sm:$0xf]  ;;  %s900_s28 = sshll.u32 %s1085_s24, 7  ;;  %s773_s27 = scalar_lea.sflag [#allocation3], %s445_s19 }
  0x1f   : > { %v463_v6 = vld [vmem:[%s454_s2] sm:$0xff]  ;;  %935 = vmatpush3.bf16.msra.mxu0 %v1005_v32  ;;  %s1282_s0 = scalar_lea.hbm %s1342_s12, %s900_s28  ;;  %p1018_p0 = pneg %p1017_p13 }
  0x20   : > { %919 = vmatmul.mubr.msk.bf16.vlgmr.msra.gmra.mrb[0].mxu1 %vm488_vm1, %v464_v3  ;;  %936 = vmatprep.subr.bf16.mxu0 %v1095_v1  ;;  %s1097_s24 = smov [#allocation2]  }
  0x21   : > { %926 = vmatprep.mubr.msk.bf16.mxu1 %vm1096_vm0, %v1095_v1  ;;  %923 = vmatpush3.bf16.msra.mxu1 %v1001_v18  ;;  %s1019_s20 = sshll.u32 %s1097_s24, 4  ;;  %s1020_s20 = int_to_ptr.vmem [resolvable:$false] %s1019_s20 }
  0x22   : > { %924 = vmatprep.subr.bf16.mxu1 %v1095_v1  ;;  %s1021_s2 = scalar_lea.vmem %s1020_s20, 256  ;;  %p1022_p1 = scmp.lt.s32.totalorder %s1284_s14, %s1020_s20 }
  0x23   : > { %937 = vmatpush3.bf16.msra.mxu0 %v1006_v33  ;;  %p1023_p2 = scmp.lt.s32.totalorder %s1021_s2, %s1015_s25 }
  0x25   : > { %925 = vmatpush3.bf16.msra.mxu1 %v1002_v19  ;;  %v897_v19 = vld [vmem:[%s1340_s10] ss:$0 sm:$0xff]  ;;  %p1024_p3 = por %p1023_p2, %p1022_p1 }
  0x27   : > { %p1025_p5 = pnand %p1024_p3, %p1018_p0 }
  0xf3   : > { %v526_v5 = vpop.f32.mrb[0].mxu1 }
  0xf4   : > { %v527_v7 = vadd.f32 %v881_v4, %v526_v5  ;;  %v920_v8 = vpop.f32.mrb[1].mxu1 }
  0xf5   : > { %v529_v9 = vpop.f32.mrb[2].mxu1 }
  0xf6   : > { %v921_v10 = vpop.f32.mrb[3].mxu1  ;;  %v532_v11 = vadd.f32 %v527_v7, %v463_v6 }
  0xf8   : > { %v535_v12 = vsel %vm488_vm1, %v532_v11, 0.0 }
  0xf9   : > { %536 = vadd.xlane.f32.xlu0 %v535_v12 }
 0x186   : > { %v537_v13 = vpop.xlane.xlu0 %536 }
 0x187   : > { %v539_v14 = vmul.f32 0.03125, %v537_v13 }
 0x189   : > { %v540_v15 = vsub.f32 %v532_v11, %v539_v14 }
 0x18b   : > { %v541_v16 = vmul.f32 %v540_v15, %v540_v15 }
 0x18d   : > { %v542_v17 = vsel %vm488_vm1, %v541_v16, 0.0 }
 0x18e   : > { %543 = vadd.xlane.f32.xlu0 %v542_v17 }
 0x21b   : > { %v544_v20 = vpop.xlane.xlu0 %543 }
 0x21c   : > { %v545_v21 = vmul.f32 0.03125, %v544_v20 }
 0x21e   : > { %v546_v22 = vadd.f32 1e-12, %v545_v21  ;;  %v898_v21 = vld [vmem:[%s1341_s11] ss:$0 sm:$0xff] }
 0x220   : > { %1007 = vrsqrt.f32 %v546_v22 }
 0x22a   : > { %v1008_v23 = vpop.eup %1007 }
 0x22b   : > { %v548_v25 = vmul.f32 %v1008_v23, %v540_v15 }
 0x22d   : > { %v555_v27 = vmul.f32 %v885_v24, %v548_v25 }
 0x22f   : > { %v562_v28 = vadd.f32 %v886_v26, %v555_v27 }
 0x231   : > { %v563_v29 = vpack.c.bf16 %v562_v28, %v562_v28 }
 0x233   : > { %927 = vmatmul.mubr.msk.bf16.vlgmr.msra.gmra.mrb[4].mxu1 %vm488_vm1, %v563_v29 }
 0x306   : > { %v624_v35 = vpop.f32.mrb[4].mxu1 }
 0x307   : > { %v625_v36 = vadd.f32 %v887_v34, %v624_v35  ;;  %v928_v37 = vpop.f32.mrb[5].mxu1 }
 0x308   : > { %v627_v38 = vpop.f32.mrb[6].mxu1 }
 0x309   : > { %v631_v39 = vmul.f32 0.70710677, %v625_v36  ;;  %v929_v40 = vpop.f32.mrb[7].mxu1  ;;  %v630_v62 = vmul.f32 0.5, %v625_v36 }
 0x30b   : > { %v632_v41 = vand.u32 2147483647, %v631_v39  ;;  %vm652_vm2 = vcmp.ge.f32.partialorder %v631_v39, 0.0 }
 0x30d   : > { %v633_v42 = vmul.f32 0.3275911, %v632_v41  ;;  %v646_v44 = vsub.f32 0.0, %v632_v41 }
 0x30f   : > { %v634_v43 = vadd.f32 1.0, %v633_v42  ;;  %v647_v46 = vmul.f32 %v646_v44, %v632_v41 }
 0x311   : > { %1009 = vrcp.f32 %v634_v43  ;;  %v648_v49 = vmul.f32 1.442695, %v647_v46 }
 0x313   : > { %1011 = vpow2.f32 %v648_v49 }
 0x31b   : > { %v1010_v45 = vpop.eup %1009 }
 0x31c   : > { %v637_v47 = vmul.f32 1.0614054, %v1010_v45 }
 0x31d   : > { %v1012_v57 = vpop.eup %1011 }
 0x31e   : > { %v638_v48 = vadd.f32 -1.4531521, %v637_v47 }
 0x320   : > { %v639_v50 = vmul.f32 %v1010_v45, %v638_v48 }
 0x322   : > { %v640_v51 = vadd.f32 1.4214138, %v639_v50 }
 0x324   : > { %v641_v52 = vmul.f32 %v1010_v45, %v640_v51 }
 0x326   : > { %v642_v53 = vadd.f32 -0.28449672, %v641_v52 }
 0x328   : > { %v643_v54 = vmul.f32 %v1010_v45, %v642_v53 }
 0x32a   : > { %v644_v55 = vadd.f32 0.2548296, %v643_v54 }
 0x32c   : > { %v645_v56 = vmul.f32 %v1010_v45, %v644_v55 }
 0x32e   : > { %v650_v58 = vmul.f32 %v1012_v57, %v645_v56 }
 0x330   : > { %v651_v59 = vsub.f32 1.0, %v650_v58 }
 0x332   : > { %v653_v60 = vsub.f32 0.0, %v651_v59 }
 0x334   : > { %v654_v61 = vsel %vm652_vm2, %v651_v59, %v653_v60 }
 0x335   : > { %v655_v63 = vadd.f32 1.0, %v654_v61 }
 0x337   : > { %v656_v0 = vmul.f32 %v655_v63, %v630_v62 }
 0x339   : > { %v657_v1 = vpack.c.bf16 %v656_v0, %v656_v0 }
 0x33b   : > { %939 = vmatmul.mubr.msk.bf16.vlgmr.msra.gmra.mrb[0].mxu0 %vm697_vm3, %v657_v1 }
 0x40e   : > { %v735_v3 = vpop.f32.mrb[0].mxu0 }
 0x40f   : > { %v736_v4 = vadd.f32 %v891_v2, %v735_v3  ;;  %v940_v5 = vpop.f32.mrb[1].mxu0 }
 0x410   : > { %v738_v6 = vpop.f32.mrb[2].mxu0 }
 0x411   : > { %v941_v7 = vpop.f32.mrb[3].mxu0  ;;  %v741_v8 = vadd.f32 %v736_v4, %v562_v28 }
 0x413   : > { %v744_v9 = vsel %vm488_vm1, %v741_v8, 0.0 }
 0x414   : > { %745 = vadd.xlane.f32.xlu1 %v744_v9 }
 0x4a1   : > { %v746_v10 = vpop.xlane.xlu1 %745 }
 0x4a2   : > { %v747_v11 = vmul.f32 0.03125, %v746_v10 }
 0x4a4   : > { %v748_v12 = vsub.f32 %v741_v8, %v747_v11 }
 0x4a6   : > { %v749_v13 = vmul.f32 %v748_v12, %v748_v12 }
 0x4a8   : > { %v750_v14 = vsel %vm488_vm1, %v749_v13, 0.0 }
 0x4a9   : > { %751 = vadd.xlane.f32.xlu1 %v750_v14 }
 0x536   : > { %v752_v15 = vpop.xlane.xlu1 %751 }
 0x537   : > { %v753_v16 = vmul.f32 0.03125, %v752_v15 }
 0x539   : > { %v754_v17 = vadd.f32 1e-12, %v753_v16 }
 0x53b   : > { %1013 = vrsqrt.f32 %v754_v17 }
 0x545   : > { %v1014_v18 = vpop.eup %1013 }
 0x546   : > { %v756_v20 = vmul.f32 %v1014_v18, %v748_v12 }
 0x548   : > { %v763_v22 = vmul.f32 %v897_v19, %v756_v20 }
 0x54a   : > { %v770_v23 = vadd.f32 %v898_v21, %v763_v22 }
 0x54c   : > { %771 = vst.msk [vmem:[%s447_s30] sm:$0xff] %vm488_vm1, %v770_v23 }
 0x54d   : > { %1028 = shalt.err (!%p1025_p5)
}
 0x54e   : > { %s1029_s19 = scalar_lea.hbm %s1282_s0, 128  ;;  %s1033_s30 = scalar_lea.hbm %s1342_s12, 256 }
 0x54f   : > { %p1030_p6 = scmp.ne.s32.totalorder %s1282_s0, %s1029_s19  ;;  %p1034_p10 = scmp.lt.u32.totalorder %s1282_s0, %s1342_s12 }
 0x550   : > { %p1035_p11 = scmp.lt.u32.totalorder %s1033_s30, %s1029_s19  ;;  %p1037_p13 = scmp.lt.u32.totalorder %s1029_s19, %s1282_s0 }
 0x551   : > { %p1031_p7 = pnand %p1030_p6, %p1203_p4 }
 0x552   : > { %p1036_p12 = por %p1035_p11, %p1034_p10 }
 0x553   : > { %p1032_p9 = pneg %p1031_p7 }
 0x554   : > { %p1038_p0 = por %p1037_p13, %p1036_p12 }
 0x556   : > { %p1039_p1 = pnand %p1038_p0, %p1032_p9 }
 0x558   : > { %1042 = shalt.err (!%p1039_p1)
}
 0x559   : > { %942 = dma.vmem_to_hbm [thread:$0]  (%p1203_p4), %s1284_s14, 128, %s1282_s0, %s773_s27  }
 0x55a PF: > { %p948_p2 = scmp.ge.s32.totalorder %s1093_s26, 2  ;;  %s799_s25 = sand.u32 1, %s1073_s21  }
 0x55b   : > { %s800_s24 = scalar_lea.sflag [#allocation3], %s799_s25 }
 0x55c   : > { %p945_p3 = pnand %p948_p2, %p1210_p8 }
 0x55e   : > { %1068 = dma.done.wait (!%p945_p3), %s800_s24, 128  }
 0x55f   : > { %1070 = vsyncadd (!%p945_p3), %s800_s24, 4294967168  ;;  %s25_s26 = sadd.s32 1, %s1093_s26   ;;  %s1353_s24 = sld [smem:[#allocation5_spill]] }
 0x560   : > { %p22_p5 = scmp.ge.s32.totalorder %s25_s26, 4   ;;  %s1354_s25 = sld [smem:[#allocation6_spill]] }
 0x561   : > { %s1355_s21 = smov %s1077_s22  ;;  %s1356_s22 = smov %s1081_s23 }
 0x562   : > { %s1357_s23 = smov %s1216_s16  ;;  %24 = sbr.rel (!%p22_p5) target bundleno = 7 (0x7), region = 106 }
 0x569   :  { %805 = vsyncpa [#allocation3], 1 }
 0x56a   :  { %807 = vsyncpa [#allocation3 + $0x1], 1 }

</bundles_post_ra>
